<compile_context>
chip_gen: v6e
topology: v6e:2x2x1
jax: 0.10.0
libtpu: 0.0.40
codegen_flags: <defaults>
</compile_context>

<pallas_src>
import functools

import jax
import jax.numpy as jnp
from jax import lax
from jax.experimental import pallas as pl
from jax.experimental.pallas import tpu as pltpu

EPS = 1e-5
_HALO = 8          # tile-aligned time halo (must be >= kernel_size // 2)


# ----------------------------------------------------------------------------------
# Fused kernel: all layers + final linear, one batch element per grid step.
# ----------------------------------------------------------------------------------
def _fused_kernel(x_ref, cond_ref, wcol_ref, cb_ref, ws_ref, bs_ref, wb_ref, bb_ref,
                  lw_ref, lb_ref, o_ref, xp_ref, xcol_ref,
                  *, n_layers, kernel_size, eps):
    K = kernel_size
    pad = K // 2
    T = x_ref.shape[1]
    C = x_ref.shape[2]
    mm_dtype = wcol_ref.dtype                      # bf16 matmul operands

    cond = cond_ref[0]                             # (T, C)  bf16, reused every layer
    h = x_ref[0].astype(jnp.float32)               # (T, C)  f32 running activation

    # Zero the halo scratch once; only the center rows are rewritten per layer.
    xp_ref[...] = jnp.zeros(xp_ref.shape, xp_ref.dtype)

    for l in range(n_layers):                      # static unroll; weights VMEM-resident
        # ---- Conv1d (same padding) as ONE K*C-deep MXU contraction ----
        xp_ref[pl.ds(_HALO, T), :] = h             # aligned store into the halo buffer
        for k in range(K):                         # im2col: lane-aligned scratch writes
            xcol_ref[:, pl.ds(k * C, C)] = (
                xp_ref[pl.ds(_HALO - pad + k, T), :].astype(mm_dtype))
        a = jnp.dot(xcol_ref[...], wcol_ref[l],
                    preferred_element_type=jnp.float32)          # (T, C) f32
        a = jnp.maximum(a + cb_ref[l], 0.0)                       # conv bias + ReLU

        # ---- Conditional_LayerNorm: normalize over time (axis 0), per channel ----
        mean = jnp.mean(a, axis=0, keepdims=True)                 # (1, C)
        var = jnp.mean((a - mean) ** 2, axis=0, keepdims=True)    # (1, C)
        inv_std = lax.rsqrt(var + eps)                            # EUP slot
        scale = jnp.dot(cond, ws_ref[l],
                        preferred_element_type=jnp.float32) + bs_ref[l]   # (T, C)
        bias = jnp.dot(cond, wb_ref[l],
                       preferred_element_type=jnp.float32) + bb_ref[l]    # (T, C)
        h = (a - mean) * (inv_std * scale) + bias                 # fold 1/std into scale
        # TODO(synk): nn.Dropout(0.1) omitted — identity at inference time.

    # ---- Final Linear (fused, no extra HBM pass / transpose) ----
    out = jnp.dot(h.astype(mm_dtype), lw_ref[...],
                  preferred_element_type=jnp.float32) + lb_ref[...]
    o_ref[0] = out.astype(o_ref.dtype)


# ----------------------------------------------------------------------------------
# One-time weight packing (done in the wrapper, outside the kernel):
#   - conv weight [C_out, C_in, K] -> im2col weight [K*C, C_out] (layer-0 C_in padded)
#   - CLN Linear weights pre-transposed so the kernel does cond @ W^T with no .T
# ----------------------------------------------------------------------------------
def _pack_params(params, mm_dtype):
    layers = params["layers"]
    C = layers[0]["conv_w"].shape[0]               # n_chans
    K = layers[0]["conv_w"].shape[-1]
    wcols, cbs, wss, bss, wbs, bbs = [], [], [], [], [], []
    for lp in layers:
        w = lp["conv_w"]                           # [C_out, C_in, K]
        if w.shape[1] < C:                         # zero-pad layer-0 input channels
            w = jnp.pad(w, ((0, 0), (0, C - w.shape[1]), (0, 0)))
        wcols.append(jnp.transpose(w, (2, 1, 0)).reshape(K * C, C))   # [K*C, C]
        cbs.append(lp["conv_b"].reshape(1, C))
        wss.append(lp["ws_w"].T)                   # cond @ W_scale^T
        bss.append(lp["ws_b"].reshape(1, C))
        wbs.append(lp["wb_w"].T)                   # cond @ W_bias^T
        bbs.append(lp["wb_b"].reshape(1, C))
    return dict(
        wcol=jnp.stack(wcols).astype(mm_dtype),    # [L, K*C, C]  bf16
        cb=jnp.stack(cbs).astype(jnp.float32),     # [L, 1, C]
        ws=jnp.stack(wss).astype(mm_dtype),        # [L, C, C]
        bs=jnp.stack(bss).astype(jnp.float32),
        wb=jnp.stack(wbs).astype(mm_dtype),
        bb=jnp.stack(bbs).astype(jnp.float32),
        lw=params["lin_w"].T.astype(mm_dtype),     # [C, odim]
        lb=params["lin_b"].reshape(1, -1).astype(jnp.float32),
    )


# ----------------------------------------------------------------------------------
# Full forward pass (mirrors CondPitchPredictor.forward, inference mode)
# ----------------------------------------------------------------------------------
def cond_pitch_predictor(x, cond, params, *, mm_dtype=jnp.bfloat16, eps=EPS):
    """x: [B, T, idim], cond: [B, T, n_chans] -> [B, T, odim]"""
    B, T, idim = x.shape
    C = cond.shape[-1]
    L = len(params["layers"])
    K = params["layers"][0]["conv_w"].shape[-1]
    odim = params["lin_w"].shape[0]
    assert _HALO >= K // 2, "kernel_size too large for the fixed halo"

    p = _pack_params(params, mm_dtype)
    xc = jnp.pad(x, ((0, 0), (0, 0), (0, C - idim))).astype(jnp.float32)  # one-time chan pad
    condc = cond.astype(mm_dtype)                                         # halve HBM traffic

    kern = functools.partial(_fused_kernel, n_layers=L, kernel_size=K, eps=eps)

    flops = int(B * (L * (2 * T * K * C * C + 4 * T * C * C) + 2 * T * C * odim))
    bytes_accessed = int(
        B * T * C * 4 + B * T * C * 2 + B * T * odim * 4
        + (L * K * C * C + 2 * L * C * C + C * odim) * 2   # bf16 weights
        + (3 * L * C + odim) * 4)                           # f32 biases

    return pl.pallas_call(
        kern,
        out_shape=jax.ShapeDtypeStruct((B, T, odim), jnp.float32),
        grid=(B,),
        in_specs=[
            pl.BlockSpec((1, T, C), lambda b: (b, 0, 0)),       # x (channel-padded, f32)
            pl.BlockSpec((1, T, C), lambda b: (b, 0, 0)),       # cond (bf16)
            pl.BlockSpec((L, K * C, C), lambda b: (0, 0, 0)),   # im2col conv weights
            pl.BlockSpec((L, 1, C), lambda b: (0, 0, 0)),       # conv bias
            pl.BlockSpec((L, C, C), lambda b: (0, 0, 0)),       # W_scale^T
            pl.BlockSpec((L, 1, C), lambda b: (0, 0, 0)),       # W_scale bias
            pl.BlockSpec((L, C, C), lambda b: (0, 0, 0)),       # W_bias^T
            pl.BlockSpec((L, 1, C), lambda b: (0, 0, 0)),       # W_bias bias
            pl.BlockSpec((C, odim), lambda b: (0, 0)),          # final Linear W^T
            pl.BlockSpec((1, odim), lambda b: (0, 0)),          # final Linear bias
        ],
        out_specs=pl.BlockSpec((1, T, odim), lambda b: (b, 0, 0)),
        scratch_shapes=[
            pltpu.VMEM((T + 2 * _HALO, C), jnp.float32),        # zero-halo padded activation
            pltpu.VMEM((T, K * C), mm_dtype),                   # im2col slab (MXU lhs)
        ],
        compiler_params=pltpu.CompilerParams(
            dimension_semantics=("parallel",),
            vmem_limit_bytes=32 * 1024 * 1024,
        ),
        cost_estimate=pl.CostEstimate(
            flops=flops, transcendentals=int(B * L * C),
            bytes_accessed=bytes_accessed),
    )(xc, condc, p["wcol"], p["cb"], p["ws"], p["bs"],
      p["wb"], p["bb"], p["lw"], p["lb"])


# ----------------------------------------------------------------------------------
# Deterministic synthetic params (PyTorch-layout shapes).  Non-zero W_scale/W_bias
# weights so the CLN matmuls are actually exercised (real init is 0/1/0/0).
# ----------------------------------------------------------------------------------
def init_params(key, idim, n_layers, n_chans, odim, kernel_size):
    layers = []
    for i in range(n_layers):
        in_c = idim if i == 0 else n_chans
        key, k0, k1, k2, k3 = jax.random.split(key, 5)
        layers.append(dict(
            conv_w=jax.random.normal(k0, (n_chans, in_c, kernel_size), jnp.float32) * 0.1,
            conv_b=jax.random.normal(k1, (n_chans,), jnp.float32) * 0.1,
            ws_w=jax.random.normal(k2, (n_chans, n_chans), jnp.float32) * 0.05,
            ws_b=jnp.ones((n_chans,), jnp.float32),
            wb_w=jax.random.normal(k3, (n_chans, n_chans), jnp.float32) * 0.05,
            wb_b=jnp.zeros((n_chans,), jnp.float32),
        ))
    key, k1, k2 = jax.random.split(key, 3)
    return dict(layers=layers,
                lin_w=jax.random.normal(k1, (odim, n_chans), jnp.float32) * 0.1,
                lin_b=jax.random.normal(k2, (odim,), jnp.float32) * 0.1)


# ----------------------------------------------------------------------------------
# Pure-JAX reference with the SAME bf16 matmul-operand casts (f32 accumulation).
# ----------------------------------------------------------------------------------
def ref_forward(x, cond, params, *, mm_dtype=jnp.bfloat16, eps=EPS):
    B, T, _ = x.shape
    cond_m = cond.astype(mm_dtype)
    h = x.astype(jnp.float32)
    for lp in params["layers"]:
        w = lp["conv_w"]                            # [C_out, C_in, K]
        C_out, C_in, K = w.shape
        pad = K // 2
        hp = jnp.pad(h, ((0, 0), (pad, pad), (0, 0)))
        xcol = jnp.concatenate([hp[:, k:k + T, :] for k in range(K)], axis=-1)
        wcol = jnp.transpose(w, (2, 1, 0)).reshape(K * C_in, C_out)
        a = jnp.einsum("btk,kc->btc", xcol.astype(mm_dtype), wcol.astype(mm_dtype),
                       preferred_element_type=jnp.float32)
        a = jnp.maximum(a + lp["conv_b"][None, None, :], 0.0)
        mean = a.mean(axis=1, keepdims=True)
        var = ((a - mean) ** 2).mean(axis=1, keepdims=True)
        inv_std = lax.rsqrt(var + eps)
        scale = jnp.einsum("btc,cd->btd", cond_m, lp["ws_w"].T.astype(mm_dtype),
                           preferred_element_type=jnp.float32) + lp["ws_b"][None, None, :]
        bias = jnp.einsum("btc,cd->btd", cond_m, lp["wb_w"].T.astype(mm_dtype),
                          preferred_element_type=jnp.float32) + lp["wb_b"][None, None, :]
        h = (a - mean) * (inv_std * scale) + bias
    return jnp.einsum("btc,cd->btd", h.astype(mm_dtype),
                      params["lin_w"].T.astype(mm_dtype),
                      preferred_element_type=jnp.float32) + params["lin_b"][None, None, :]


if __name__ == "__main__":
    B, T = 2, 16
    idim, n_chans, odim = 64, 128, 2
    n_layers, kernel_size = 2, 5

    key = jax.random.PRNGKey(0)
    kx, kc, kp = jax.random.split(key, 3)
    x = jax.random.normal(kx, (B, T, idim), jnp.float32)
    cond = jax.random.normal(kc, (B, T, n_chans), jnp.float32)
    params = init_params(kp, idim, n_layers, n_chans, odim, kernel_size)

    fwd = jax.jit(cond_pitch_predictor)
    out = jax.block_until_ready(fwd(x, cond, params))
    assert out.shape == (B, T, odim), out.shape

    ref = jax.block_until_ready(ref_forward(x, cond, params))
    max_err = float(jnp.max(jnp.abs(out - ref)))
    assert jnp.allclose(out, ref, atol=1e-2, rtol=1e-2), max_err

    print("KERNEL_OK")
</pallas_src>

<mosaic_0001>
module attributes {stable_mosaic.version = 11 : i64} {
  func.func @_fused_kernel(%arg0: i32, %arg1: memref<1x16x128xf32, #tpu.memory_space<vmem>>, %arg2: memref<1x16x128xbf16, #tpu.memory_space<vmem>>, %arg3: memref<2x640x128xbf16, #tpu.memory_space<vmem>>, %arg4: memref<2x1x128xf32, #tpu.memory_space<vmem>>, %arg5: memref<2x128x128xbf16, #tpu.memory_space<vmem>>, %arg6: memref<2x1x128xf32, #tpu.memory_space<vmem>>, %arg7: memref<2x128x128xbf16, #tpu.memory_space<vmem>>, %arg8: memref<2x1x128xf32, #tpu.memory_space<vmem>>, %arg9: memref<128x2xbf16, #tpu.memory_space<vmem>>, %arg10: memref<1x2xf32, #tpu.memory_space<vmem>>, %arg11: memref<1x16x2xf32, #tpu.memory_space<vmem>>, %arg12: memref<32x128xf32, #tpu.memory_space<vmem>>, %arg13: memref<16x640xbf16, #tpu.memory_space<vmem>>) attributes {dimension_semantics = [#tpu.dimension_semantics<parallel>], iteration_bounds = array<i64: 2>, scalar_prefetch = 0 : i64, scratch_operands = 2 : i64, tpu.core_type = #tpu.core_type<tc>, window_params = [{transform_indices = @transform_0, window_bounds = array<i64: 1, 16, 128>}, {transform_indices = @transform_1, window_bounds = array<i64: 1, 16, 128>}, {pipeline_mode = #tpu.pipeline_mode<synchronous>, transform_indices = @transform_2, window_bounds = array<i64: 2, 640, 128>}, {pipeline_mode = #tpu.pipeline_mode<synchronous>, transform_indices = @transform_3, window_bounds = array<i64: 2, 1, 128>}, {pipeline_mode = #tpu.pipeline_mode<synchronous>, transform_indices = @transform_4, window_bounds = array<i64: 2, 128, 128>}, {pipeline_mode = #tpu.pipeline_mode<synchronous>, transform_indices = @transform_5, window_bounds = array<i64: 2, 1, 128>}, {pipeline_mode = #tpu.pipeline_mode<synchronous>, transform_indices = @transform_6, window_bounds = array<i64: 2, 128, 128>}, {pipeline_mode = #tpu.pipeline_mode<synchronous>, transform_indices = @transform_7, window_bounds = array<i64: 2, 1, 128>}, {pipeline_mode = #tpu.pipeline_mode<synchronous>, transform_indices = @transform_8, window_bounds = array<i64: 128, 2>}, {pipeline_mode = #tpu.pipeline_mode<synchronous>, transform_indices = @transform_9, window_bounds = array<i64: 1, 2>}, {transform_indices = @transform_10, window_bounds = array<i64: 1, 16, 2>}]} {
    %c0 = arith.constant 0 : index
    %c0_0 = arith.constant 0 : index
    %c0_1 = arith.constant 0 : index
    %0 = vector.load %arg2[%c0, %c0_0, %c0_1] : memref<1x16x128xbf16, #tpu.memory_space<vmem>>, vector<1x16x128xbf16>
    %1 = vector.shape_cast %0 : vector<1x16x128xbf16> to vector<16x128xbf16>
    %c0_2 = arith.constant 0 : index
    %c0_3 = arith.constant 0 : index
    %c0_4 = arith.constant 0 : index
    %2 = vector.load %arg1[%c0_2, %c0_3, %c0_4] : memref<1x16x128xf32, #tpu.memory_space<vmem>>, vector<1x16x128xf32>
    %3 = vector.shape_cast %2 : vector<1x16x128xf32> to vector<16x128xf32>
    %cst = arith.constant 0.000000e+00 : f32
    %4 = vector.broadcast %cst : f32 to vector<32x128xf32>
    %c0_5 = arith.constant 0 : index
    %c0_6 = arith.constant 0 : index
    %5 = vector.load %arg12[%c0_5, %c0_6] : memref<32x128xf32, #tpu.memory_space<vmem>>, vector<32x128xf32>
    tpu.vector_store %arg12[%c0_5, %c0_6], %4 {strides = array<i32>} : memref<32x128xf32, #tpu.memory_space<vmem>>, vector<32x128xf32>,
    %c8 = arith.constant 8 : index
    %c0_7 = arith.constant 0 : index
    %6 = vector.load %arg12[%c8, %c0_7] : memref<32x128xf32, #tpu.memory_space<vmem>>, vector<16x128xf32>
    tpu.vector_store %arg12[%c8, %c0_7], %3 {strides = array<i32>} : memref<32x128xf32, #tpu.memory_space<vmem>>, vector<16x128xf32>,
    %c6 = arith.constant 6 : index
    %c0_8 = arith.constant 0 : index
    %7 = vector.load %arg12[%c6, %c0_8] : memref<32x128xf32, #tpu.memory_space<vmem>>, vector<16x128xf32>
    %8 = arith.truncf %7 : vector<16x128xf32> to vector<16x128xbf16>
    %c0_9 = arith.constant 0 : index
    %c0_10 = arith.constant 0 : index
    %9 = vector.load %arg13[%c0_9, %c0_10] : memref<16x640xbf16, #tpu.memory_space<vmem>>, vector<16x128xbf16>
    tpu.vector_store %arg13[%c0_9, %c0_10], %8 {strides = array<i32>} : memref<16x640xbf16, #tpu.memory_space<vmem>>, vector<16x128xbf16>,
    %c7 = arith.constant 7 : index
    %c0_11 = arith.constant 0 : index
    %10 = vector.load %arg12[%c7, %c0_11] : memref<32x128xf32, #tpu.memory_space<vmem>>, vector<16x128xf32>
    %11 = arith.truncf %10 : vector<16x128xf32> to vector<16x128xbf16>
    %c0_12 = arith.constant 0 : index
    %c128 = arith.constant 128 : index
    %12 = vector.load %arg13[%c0_12, %c128] : memref<16x640xbf16, #tpu.memory_space<vmem>>, vector<16x128xbf16>
    tpu.vector_store %arg13[%c0_12, %c128], %11 {strides = array<i32>} : memref<16x640xbf16, #tpu.memory_space<vmem>>, vector<16x128xbf16>,
    %c8_13 = arith.constant 8 : index
    %c0_14 = arith.constant 0 : index
    %13 = vector.load %arg12[%c8_13, %c0_14] : memref<32x128xf32, #tpu.memory_space<vmem>>, vector<16x128xf32>
    %14 = arith.truncf %13 : vector<16x128xf32> to vector<16x128xbf16>
    %c0_15 = arith.constant 0 : index
    %c256 = arith.constant 256 : index
    %15 = vector.load %arg13[%c0_15, %c256] : memref<16x640xbf16, #tpu.memory_space<vmem>>, vector<16x128xbf16>
    tpu.vector_store %arg13[%c0_15, %c256], %14 {strides = array<i32>} : memref<16x640xbf16, #tpu.memory_space<vmem>>, vector<16x128xbf16>,
    %c9 = arith.constant 9 : index
    %c0_16 = arith.constant 0 : index
    %16 = vector.load %arg12[%c9, %c0_16] : memref<32x128xf32, #tpu.memory_space<vmem>>, vector<16x128xf32>
    %17 = arith.truncf %16 : vector<16x128xf32> to vector<16x128xbf16>
    %c0_17 = arith.constant 0 : index
    %c384 = arith.constant 384 : index
    %18 = vector.load %arg13[%c0_17, %c384] : memref<16x640xbf16, #tpu.memory_space<vmem>>, vector<16x128xbf16>
    tpu.vector_store %arg13[%c0_17, %c384], %17 {strides = array<i32>} : memref<16x640xbf16, #tpu.memory_space<vmem>>, vector<16x128xbf16>,
    %c10 = arith.constant 10 : index
    %c0_18 = arith.constant 0 : index
    %19 = vector.load %arg12[%c10, %c0_18] : memref<32x128xf32, #tpu.memory_space<vmem>>, vector<16x128xf32>
    %20 = arith.truncf %19 : vector<16x128xf32> to vector<16x128xbf16>
    %c0_19 = arith.constant 0 : index
    %c512 = arith.constant 512 : index
    %21 = vector.load %arg13[%c0_19, %c512] : memref<16x640xbf16, #tpu.memory_space<vmem>>, vector<16x128xbf16>
    tpu.vector_store %arg13[%c0_19, %c512], %20 {strides = array<i32>} : memref<16x640xbf16, #tpu.memory_space<vmem>>, vector<16x128xbf16>,
    %c0_20 = arith.constant 0 : index
    %c0_21 = arith.constant 0 : index
    %22 = vector.load %arg13[%c0_20, %c0_21] : memref<16x640xbf16, #tpu.memory_space<vmem>>, vector<16x640xbf16>
    %c0_22 = arith.constant 0 : index
    %c0_23 = arith.constant 0 : index
    %c0_24 = arith.constant 0 : index
    %23 = vector.load %arg3[%c0_22, %c0_23, %c0_24] : memref<2x640x128xbf16, #tpu.memory_space<vmem>>, vector<1x640x128xbf16>
    %24 = vector.shape_cast %23 : vector<1x640x128xbf16> to vector<640x128xbf16>
    %cst_25 = arith.constant dense<0.000000e+00> : vector<16x128xf32>
    %25 = tpu.matmul %22, %24, %cst_25 {dimension_numbers = #tpu.dot_dimension_numbers<[1], [0], [0], [1], [0, 0, 1, 1], [], []>} : vector<16x640xbf16>, vector<640x128xbf16>, vector<16x128xf32> -> vector<16x128xf32>
    %c0_26 = arith.constant 0 : index
    %c0_27 = arith.constant 0 : index
    %c0_28 = arith.constant 0 : index
    %26 = vector.load %arg4[%c0_26, %c0_27, %c0_28] : memref<2x1x128xf32, #tpu.memory_space<vmem>>, vector<1x1x128xf32>
    %27 = vector.shape_cast %26 : vector<1x1x128xf32> to vector<1x128xf32>
    %28 = vector.broadcast %27 : vector<1x128xf32> to vector<16x128xf32>
    %29 = arith.addf %25, %28 : vector<16x128xf32>
    %cst_29 = arith.constant 0.000000e+00 : f32
    %30 = vector.broadcast %cst_29 : f32 to vector<16x128xf32>
    %31 = arith.maximumf %29, %30 : vector<16x128xf32>
    %cst_30 = arith.constant dense<0.000000e+00> : vector<128xf32>
    %32 = vector.multi_reduction <add>, %31, %cst_30 [0] : vector<16x128xf32> to vector<128xf32>
    %33 = vector.shape_cast %32 : vector<128xf32> to vector<1x128xf32>
    %cst_31 = arith.constant 1.600000e+01 : f32
    %34 = vector.broadcast %cst_31 : f32 to vector<1x128xf32>
    %35 = arith.divf %33, %34 : vector<1x128xf32>
    %36 = vector.broadcast %35 : vector<1x128xf32> to vector<16x128xf32>
    %37 = arith.subf %31, %36 : vector<16x128xf32>
    %38 = arith.mulf %37, %37 : vector<16x128xf32>
    %cst_32 = arith.constant dense<0.000000e+00> : vector<128xf32>
    %39 = vector.multi_reduction <add>, %38, %cst_32 [0] : vector<16x128xf32> to vector<128xf32>
    %40 = vector.shape_cast %39 : vector<128xf32> to vector<1x128xf32>
    %cst_33 = arith.constant 1.600000e+01 : f32
    %41 = vector.broadcast %cst_33 : f32 to vector<1x128xf32>
    %42 = arith.divf %40, %41 : vector<1x128xf32>
    %cst_34 = arith.constant 9.99999974E-6 : f32
    %43 = vector.broadcast %cst_34 : f32 to vector<1x128xf32>
    %44 = arith.addf %42, %43 : vector<1x128xf32>
    %45 = math.rsqrt %44 : vector<1x128xf32>
    %c0_35 = arith.constant 0 : index
    %c0_36 = arith.constant 0 : index
    %c0_37 = arith.constant 0 : index
    %46 = vector.load %arg5[%c0_35, %c0_36, %c0_37] : memref<2x128x128xbf16, #tpu.memory_space<vmem>>, vector<1x128x128xbf16>
    %47 = vector.shape_cast %46 : vector<1x128x128xbf16> to vector<128x128xbf16>
    %cst_38 = arith.constant dense<0.000000e+00> : vector<16x128xf32>
    %48 = tpu.matmul %1, %47, %cst_38 {dimension_numbers = #tpu.dot_dimension_numbers<[1], [0], [0], [1], [0, 0, 1, 1], [], []>} : vector<16x128xbf16>, vector<128x128xbf16>, vector<16x128xf32> -> vector<16x128xf32>
    %c0_39 = arith.constant 0 : index
    %c0_40 = arith.constant 0 : index
    %c0_41 = arith.constant 0 : index
    %49 = vector.load %arg6[%c0_39, %c0_40, %c0_41] : memref<2x1x128xf32, #tpu.memory_space<vmem>>, vector<1x1x128xf32>
    %50 = vector.shape_cast %49 : vector<1x1x128xf32> to vector<1x128xf32>
    %51 = vector.broadcast %50 : vector<1x128xf32> to vector<16x128xf32>
    %52 = arith.addf %48, %51 : vector<16x128xf32>
    %c0_42 = arith.constant 0 : index
    %c0_43 = arith.constant 0 : index
    %c0_44 = arith.constant 0 : index
    %53 = vector.load %arg7[%c0_42, %c0_43, %c0_44] : memref<2x128x128xbf16, #tpu.memory_space<vmem>>, vector<1x128x128xbf16>
    %54 = vector.shape_cast %53 : vector<1x128x128xbf16> to vector<128x128xbf16>
    %cst_45 = arith.constant dense<0.000000e+00> : vector<16x128xf32>
    %55 = tpu.matmul %1, %54, %cst_45 {dimension_numbers = #tpu.dot_dimension_numbers<[1], [0], [0], [1], [0, 0, 1, 1], [], []>} : vector<16x128xbf16>, vector<128x128xbf16>, vector<16x128xf32> -> vector<16x128xf32>
    %c0_46 = arith.constant 0 : index
    %c0_47 = arith.constant 0 : index
    %c0_48 = arith.constant 0 : index
    %56 = vector.load %arg8[%c0_46, %c0_47, %c0_48] : memref<2x1x128xf32, #tpu.memory_space<vmem>>, vector<1x1x128xf32>
    %57 = vector.shape_cast %56 : vector<1x1x128xf32> to vector<1x128xf32>
    %58 = vector.broadcast %57 : vector<1x128xf32> to vector<16x128xf32>
    %59 = arith.addf %55, %58 : vector<16x128xf32>
    %60 = vector.broadcast %35 : vector<1x128xf32> to vector<16x128xf32>
    %61 = arith.subf %31, %60 : vector<16x128xf32>
    %62 = vector.broadcast %45 : vector<1x128xf32> to vector<16x128xf32>
    %63 = arith.mulf %62, %52 : vector<16x128xf32>
    %64 = arith.mulf %61, %63 : vector<16x128xf32>
    %65 = arith.addf %64, %59 : vector<16x128xf32>
    %c8_49 = arith.constant 8 : index
    %c0_50 = arith.constant 0 : index
    %66 = vector.load %arg12[%c8_49, %c0_50] : memref<32x128xf32, #tpu.memory_space<vmem>>, vector<16x128xf32>
    tpu.vector_store %arg12[%c8_49, %c0_50], %65 {strides = array<i32>} : memref<32x128xf32, #tpu.memory_space<vmem>>, vector<16x128xf32>,
    %c6_51 = arith.constant 6 : index
    %c0_52 = arith.constant 0 : index
    %67 = vector.load %arg12[%c6_51, %c0_52] : memref<32x128xf32, #tpu.memory_space<vmem>>, vector<16x128xf32>
    %68 = arith.truncf %67 : vector<16x128xf32> to vector<16x128xbf16>
    %c0_53 = arith.constant 0 : index
    %c0_54 = arith.constant 0 : index
    %69 = vector.load %arg13[%c0_53, %c0_54] : memref<16x640xbf16, #tpu.memory_space<vmem>>, vector<16x128xbf16>
    tpu.vector_store %arg13[%c0_53, %c0_54], %68 {strides = array<i32>} : memref<16x640xbf16, #tpu.memory_space<vmem>>, vector<16x128xbf16>,
    %c7_55 = arith.constant 7 : index
    %c0_56 = arith.constant 0 : index
    %70 = vector.load %arg12[%c7_55, %c0_56] : memref<32x128xf32, #tpu.memory_space<vmem>>, vector<16x128xf32>
    %71 = arith.truncf %70 : vector<16x128xf32> to vector<16x128xbf16>
    %c0_57 = arith.constant 0 : index
    %c128_58 = arith.constant 128 : index
    %72 = vector.load %arg13[%c0_57, %c128_58] : memref<16x640xbf16, #tpu.memory_space<vmem>>, vector<16x128xbf16>
    tpu.vector_store %arg13[%c0_57, %c128_58], %71 {strides = array<i32>} : memref<16x640xbf16, #tpu.memory_space<vmem>>, vector<16x128xbf16>,
    %c8_59 = arith.constant 8 : index
    %c0_60 = arith.constant 0 : index
    %73 = vector.load %arg12[%c8_59, %c0_60] : memref<32x128xf32, #tpu.memory_space<vmem>>, vector<16x128xf32>
    %74 = arith.truncf %73 : vector<16x128xf32> to vector<16x128xbf16>
    %c0_61 = arith.constant 0 : index
    %c256_62 = arith.constant 256 : index
    %75 = vector.load %arg13[%c0_61, %c256_62] : memref<16x640xbf16, #tpu.memory_space<vmem>>, vector<16x128xbf16>
    tpu.vector_store %arg13[%c0_61, %c256_62], %74 {strides = array<i32>} : memref<16x640xbf16, #tpu.memory_space<vmem>>, vector<16x128xbf16>,
    %c9_63 = arith.constant 9 : index
    %c0_64 = arith.constant 0 : index
    %76 = vector.load %arg12[%c9_63, %c0_64] : memref<32x128xf32, #tpu.memory_space<vmem>>, vector<16x128xf32>
    %77 = arith.truncf %76 : vector<16x128xf32> to vector<16x128xbf16>
    %c0_65 = arith.constant 0 : index
    %c384_66 = arith.constant 384 : index
    %78 = vector.load %arg13[%c0_65, %c384_66] : memref<16x640xbf16, #tpu.memory_space<vmem>>, vector<16x128xbf16>
    tpu.vector_store %arg13[%c0_65, %c384_66], %77 {strides = array<i32>} : memref<16x640xbf16, #tpu.memory_space<vmem>>, vector<16x128xbf16>,
    %c10_67 = arith.constant 10 : index
    %c0_68 = arith.constant 0 : index
    %79 = vector.load %arg12[%c10_67, %c0_68] : memref<32x128xf32, #tpu.memory_space<vmem>>, vector<16x128xf32>
    %80 = arith.truncf %79 : vector<16x128xf32> to vector<16x128xbf16>
    %c0_69 = arith.constant 0 : index
    %c512_70 = arith.constant 512 : index
    %81 = vector.load %arg13[%c0_69, %c512_70] : memref<16x640xbf16, #tpu.memory_space<vmem>>, vector<16x128xbf16>
    tpu.vector_store %arg13[%c0_69, %c512_70], %80 {strides = array<i32>} : memref<16x640xbf16, #tpu.memory_space<vmem>>, vector<16x128xbf16>,
    %c0_71 = arith.constant 0 : index
    %c0_72 = arith.constant 0 : index
    %82 = vector.load %arg13[%c0_71, %c0_72] : memref<16x640xbf16, #tpu.memory_space<vmem>>, vector<16x640xbf16>
    %c1 = arith.constant 1 : index
    %c0_73 = arith.constant 0 : index
    %c0_74 = arith.constant 0 : index
    %83 = vector.load %arg3[%c1, %c0_73, %c0_74] : memref<2x640x128xbf16, #tpu.memory_space<vmem>>, vector<1x640x128xbf16>
    %84 = vector.shape_cast %83 : vector<1x640x128xbf16> to vector<640x128xbf16>
    %cst_75 = arith.constant dense<0.000000e+00> : vector<16x128xf32>
    %85 = tpu.matmul %82, %84, %cst_75 {dimension_numbers = #tpu.dot_dimension_numbers<[1], [0], [0], [1], [0, 0, 1, 1], [], []>} : vector<16x640xbf16>, vector<640x128xbf16>, vector<16x128xf32> -> vector<16x128xf32>
    %c1_76 = arith.constant 1 : index
    %c0_77 = arith.constant 0 : index
    %c0_78 = arith.constant 0 : index
    %86 = vector.load %arg4[%c1_76, %c0_77, %c0_78] : memref<2x1x128xf32, #tpu.memory_space<vmem>>, vector<1x1x128xf32>
    %87 = vector.shape_cast %86 : vector<1x1x128xf32> to vector<1x128xf32>
    %88 = vector.broadcast %87 : vector<1x128xf32> to vector<16x128xf32>
    %89 = arith.addf %85, %88 : vector<16x128xf32>
    %cst_79 = arith.constant 0.000000e+00 : f32
    %90 = vector.broadcast %cst_79 : f32 to vector<16x128xf32>
    %91 = arith.maximumf %89, %90 : vector<16x128xf32>
    %cst_80 = arith.constant dense<0.000000e+00> : vector<128xf32>
    %92 = vector.multi_reduction <add>, %91, %cst_80 [0] : vector<16x128xf32> to vector<128xf32>
    %93 = vector.shape_cast %92 : vector<128xf32> to vector<1x128xf32>
    %cst_81 = arith.constant 1.600000e+01 : f32
    %94 = vector.broadcast %cst_81 : f32 to vector<1x128xf32>
    %95 = arith.divf %93, %94 : vector<1x128xf32>
    %96 = vector.broadcast %95 : vector<1x128xf32> to vector<16x128xf32>
    %97 = arith.subf %91, %96 : vector<16x128xf32>
    %98 = arith.mulf %97, %97 : vector<16x128xf32>
    %cst_82 = arith.constant dense<0.000000e+00> : vector<128xf32>
    %99 = vector.multi_reduction <add>, %98, %cst_82 [0] : vector<16x128xf32> to vector<128xf32>
    %100 = vector.shape_cast %99 : vector<128xf32> to vector<1x128xf32>
    %cst_83 = arith.constant 1.600000e+01 : f32
    %101 = vector.broadcast %cst_83 : f32 to vector<1x128xf32>
    %102 = arith.divf %100, %101 : vector<1x128xf32>
    %cst_84 = arith.constant 9.99999974E-6 : f32
    %103 = vector.broadcast %cst_84 : f32 to vector<1x128xf32>
    %104 = arith.addf %102, %103 : vector<1x128xf32>
    %105 = math.rsqrt %104 : vector<1x128xf32>
    %c1_85 = arith.constant 1 : index
    %c0_86 = arith.constant 0 : index
    %c0_87 = arith.constant 0 : index
    %106 = vector.load %arg5[%c1_85, %c0_86, %c0_87] : memref<2x128x128xbf16, #tpu.memory_space<vmem>>, vector<1x128x128xbf16>
    %107 = vector.shape_cast %106 : vector<1x128x128xbf16> to vector<128x128xbf16>
    %cst_88 = arith.constant dense<0.000000e+00> : vector<16x128xf32>
    %108 = tpu.matmul %1, %107, %cst_88 {dimension_numbers = #tpu.dot_dimension_numbers<[1], [0], [0], [1], [0, 0, 1, 1], [], []>} : vector<16x128xbf16>, vector<128x128xbf16>, vector<16x128xf32> -> vector<16x128xf32>
    %c1_89 = arith.constant 1 : index
    %c0_90 = arith.constant 0 : index
    %c0_91 = arith.constant 0 : index
    %109 = vector.load %arg6[%c1_89, %c0_90, %c0_91] : memref<2x1x128xf32, #tpu.memory_space<vmem>>, vector<1x1x128xf32>
    %110 = vector.shape_cast %109 : vector<1x1x128xf32> to vector<1x128xf32>
    %111 = vector.broadcast %110 : vector<1x128xf32> to vector<16x128xf32>
    %112 = arith.addf %108, %111 : vector<16x128xf32>
    %c1_92 = arith.constant 1 : index
    %c0_93 = arith.constant 0 : index
    %c0_94 = arith.constant 0 : index
    %113 = vector.load %arg7[%c1_92, %c0_93, %c0_94] : memref<2x128x128xbf16, #tpu.memory_space<vmem>>, vector<1x128x128xbf16>
    %114 = vector.shape_cast %113 : vector<1x128x128xbf16> to vector<128x128xbf16>
    %cst_95 = arith.constant dense<0.000000e+00> : vector<16x128xf32>
    %115 = tpu.matmul %1, %114, %cst_95 {dimension_numbers = #tpu.dot_dimension_numbers<[1], [0], [0], [1], [0, 0, 1, 1], [], []>} : vector<16x128xbf16>, vector<128x128xbf16>, vector<16x128xf32> -> vector<16x128xf32>
    %c1_96 = arith.constant 1 : index
    %c0_97 = arith.constant 0 : index
    %c0_98 = arith.constant 0 : index
    %116 = vector.load %arg8[%c1_96, %c0_97, %c0_98] : memref<2x1x128xf32, #tpu.memory_space<vmem>>, vector<1x1x128xf32>
    %117 = vector.shape_cast %116 : vector<1x1x128xf32> to vector<1x128xf32>
    %118 = vector.broadcast %117 : vector<1x128xf32> to vector<16x128xf32>
    %119 = arith.addf %115, %118 : vector<16x128xf32>
    %120 = vector.broadcast %95 : vector<1x128xf32> to vector<16x128xf32>
    %121 = arith.subf %91, %120 : vector<16x128xf32>
    %122 = vector.broadcast %105 : vector<1x128xf32> to vector<16x128xf32>
    %123 = arith.mulf %122, %112 : vector<16x128xf32>
    %124 = arith.mulf %121, %123 : vector<16x128xf32>
    %125 = arith.addf %124, %119 : vector<16x128xf32>
    %126 = arith.truncf %125 : vector<16x128xf32> to vector<16x128xbf16>
    %c0_99 = arith.constant 0 : index
    %c0_100 = arith.constant 0 : index
    %127 = vector.load %arg9[%c0_99, %c0_100] : memref<128x2xbf16, #tpu.memory_space<vmem>>, vector<128x2xbf16>
    %cst_101 = arith.constant dense<0.000000e+00> : vector<16x2xf32>
    %128 = tpu.matmul %126, %127, %cst_101 {dimension_numbers = #tpu.dot_dimension_numbers<[1], [0], [0], [1], [0, 0, 1, 1], [], []>} : vector<16x128xbf16>, vector<128x2xbf16>, vector<16x2xf32> -> vector<16x2xf32>
    %c0_102 = arith.constant 0 : index
    %c0_103 = arith.constant 0 : index
    %129 = vector.load %arg10[%c0_102, %c0_103] : memref<1x2xf32, #tpu.memory_space<vmem>>, vector<1x2xf32>
    %130 = vector.broadcast %129 : vector<1x2xf32> to vector<16x2xf32>
    %131 = arith.addf %128, %130 : vector<16x2xf32>
    %c0_104 = arith.constant 0 : index
    %c0_105 = arith.constant 0 : index
    %c0_106 = arith.constant 0 : index
    %132 = vector.load %arg11[%c0_104, %c0_105, %c0_106] : memref<1x16x2xf32, #tpu.memory_space<vmem>>, vector<1x16x2xf32>
    %133 = vector.shape_cast %132 : vector<1x16x2xf32> to vector<16x2xf32>
    %134 = vector.shape_cast %131 : vector<16x2xf32> to vector<1x16x2xf32>
    tpu.vector_store %arg11[%c0_104, %c0_105, %c0_106], %134 {strides = array<i32>} : memref<1x16x2xf32, #tpu.memory_space<vmem>>, vector<1x16x2xf32>,
    return
  }
  func.func @transform_0(%arg0: i32) -> (i32, i32, i32) {
    %c0_i32 = arith.constant 0 : i32
    %c0_i32_0 = arith.constant 0 : i32
    %c0_i32_1 = arith.constant 0 : i32
    return %arg0, %c0_i32, %c0_i32_0 : i32, i32, i32
  }
  func.func @transform_1(%arg0: i32) -> (i32, i32, i32) {
    %c0_i32 = arith.constant 0 : i32
    %c0_i32_0 = arith.constant 0 : i32
    %c0_i32_1 = arith.constant 0 : i32
    return %arg0, %c0_i32, %c0_i32_0 : i32, i32, i32
  }
  func.func @transform_2(%arg0: i32) -> (i32, i32, i32) {
    %c0_i32 = arith.constant 0 : i32
    %c0_i32_0 = arith.constant 0 : i32
    %c0_i32_1 = arith.constant 0 : i32
    %c0_i32_2 = arith.constant 0 : i32
    return %c0_i32, %c0_i32_0, %c0_i32_1 : i32, i32, i32
  }
  func.func @transform_3(%arg0: i32) -> (i32, i32, i32) {
    %c0_i32 = arith.constant 0 : i32
    %c0_i32_0 = arith.constant 0 : i32
    %c0_i32_1 = arith.constant 0 : i32
    %c0_i32_2 = arith.constant 0 : i32
    return %c0_i32, %c0_i32_0, %c0_i32_1 : i32, i32, i32
  }
  func.func @transform_4(%arg0: i32) -> (i32, i32, i32) {
    %c0_i32 = arith.constant 0 : i32
    %c0_i32_0 = arith.constant 0 : i32
    %c0_i32_1 = arith.constant 0 : i32
    %c0_i32_2 = arith.constant 0 : i32
    return %c0_i32, %c0_i32_0, %c0_i32_1 : i32, i32, i32
  }
  func.func @transform_5(%arg0: i32) -> (i32, i32, i32) {
    %c0_i32 = arith.constant 0 : i32
    %c0_i32_0 = arith.constant 0 : i32
    %c0_i32_1 = arith.constant 0 : i32
    %c0_i32_2 = arith.constant 0 : i32
    return %c0_i32, %c0_i32_0, %c0_i32_1 : i32, i32, i32
  }
  func.func @transform_6(%arg0: i32) -> (i32, i32, i32) {
    %c0_i32 = arith.constant 0 : i32
    %c0_i32_0 = arith.constant 0 : i32
    %c0_i32_1 = arith.constant 0 : i32
    %c0_i32_2 = arith.constant 0 : i32
    return %c0_i32, %c0_i32_0, %c0_i32_1 : i32, i32, i32
  }
  func.func @transform_7(%arg0: i32) -> (i32, i32, i32) {
    %c0_i32 = arith.constant 0 : i32
    %c0_i32_0 = arith.constant 0 : i32
    %c0_i32_1 = arith.constant 0 : i32
    %c0_i32_2 = arith.constant 0 : i32
    return %c0_i32, %c0_i32_0, %c0_i32_1 : i32, i32, i32
  }
  func.func @transform_8(%arg0: i32) -> (i32, i32) {
    %c0_i32 = arith.constant 0 : i32
    %c0_i32_0 = arith.constant 0 : i32
    %c0_i32_1 = arith.constant 0 : i32
    return %c0_i32, %c0_i32_0 : i32, i32
  }
  func.func @transform_9(%arg0: i32) -> (i32, i32) {
    %c0_i32 = arith.constant 0 : i32
    %c0_i32_0 = arith.constant 0 : i32
    %c0_i32_1 = arith.constant 0 : i32
    return %c0_i32, %c0_i32_0 : i32, i32
  }
  func.func @transform_10(%arg0: i32) -> (i32, i32, i32) {
    %c0_i32 = arith.constant 0 : i32
    %c0_i32_0 = arith.constant 0 : i32
    %c0_i32_1 = arith.constant 0 : i32
    return %arg0, %c0_i32, %c0_i32_0 : i32, i32, i32
  }
}

</mosaic_0001>

<bundles_post_ra>
// kernel: cond_pitch_predictor.1
= control target key start
LH: loop header
LB: loop body
LE: loop exit
PB: predicated region body
PF: predicated region fallthrough
CT: control target
= control target key end

     0   :  { %s2996_s13 = smov 0   ;;  %s3492_s0 = inlined_call_operand.vmem [shape: f32[2,16,128], index: 0, kind: input, shape index: {}]   ;;  %s3493_s1 = inlined_call_operand.vmem [shape: bf16[2,16,128], index: 1, kind: input, shape index: {}]   ;;  %s3494_s2 = inlined_call_operand.vmem [shape: bf16[2,640,128], index: 2, kind: input, shape index: {}]   ;;  %s3495_s3 = inlined_call_operand.vmem [shape: f32[2,1,128], index: 3, kind: input, shape index: {}]   ;;  %s3496_s4 = inlined_call_operand.vmem [shape: bf16[2,128,128], index: 4, kind: input, shape index: {}]   ;;  %s3497_s5 = inlined_call_operand.vmem [shape: f32[2,1,128], index: 5, kind: input, shape index: {}]   ;;  %s3498_s6 = inlined_call_operand.vmem [shape: bf16[2,128,128], index: 6, kind: input, shape index: {}]   ;;  %s3499_s7 = inlined_call_operand.vmem [shape: f32[2,1,128], index: 7, kind: input, shape index: {}]   ;;  %s3500_s8 = inlined_call_operand.vmem [shape: bf16[128,2], index: 8, kind: input, shape index: {}]   ;;  %s3501_s9 = inlined_call_operand.vmem [shape: f32[1,2], index: 9, kind: input, shape index: {}]   ;;  %s3502_s10 = inlined_call_operand.vmem [shape: f32[2,16,2], index: 10, kind: output, shape index: {}]  }
   0x1 LB: > { %s2181_s14 = sadd.s32 4294967295, %s2937_s13   ;;  %p2185_p0 = scmp.ge.s32.totalorder %s2937_s13, 1  ;;  %s2937_s13 = sphi %s2996_s13, %s20_s13  }
   0x2   : > { %p322_p1 = scmp.lt.s32.totalorder %s2937_s13, 3 }
   0x4   : > { %p323_p2 = pnand %p2185_p0, %p322_p1 }
   0x5   : > { %p365_p3 = scmp.lt.s32.totalorder (!%p323_p2), %s2181_s14, 1 }
   0x6   : > { %326 = sbr.rel (%p323_p2) target bundleno = 848 (0x350), region = 60 }
   0xb   : > { %v2791_v0 = vld [vmem:[%s3494_s2 + $0x78] sm:$0xff]   ;;  %v2939_v3 = vmov 0.0   ;;  %v2795_v5 = vld [vmem:[%s3494_s2 + $0x70] sm:$0xff]   ;;  %v2799_v9 = vld [vmem:[%s3494_s2 + $0x68] sm:$0xff]   ;;  %s3504_s14 = smov (!%p365_p3, %s2181_s14), 1  ;;  %vm2940_vm0 = vmmov 0  }
   0xc   : > { %v2792_v1 = vld [vmem:[%s3494_s2 + $0x38] sm:$0xff]   ;;  %2490 = vmatprep.subr.bf16.mxu0 %v2791_v0  ;;  %385 = vst [vmem:[#allocation2] sm:$0xff] %v2939_v3  ;;  %388 = vst [vmem:[#allocation2 + $0x18] sm:$0xff] %v2939_v3  ;;  %v2796_v6 = vld [vmem:[%s3494_s2 + $0x30] sm:$0xff]   ;;  %s2467_s11 = sshll.u32 %s3504_s14, 4  ;;  %vm2111_vm1 = vcmask 15360  }
   0xd   : > { %v2793_v2 = vld [vmem:[%s3494_s2 + $0xf8] sm:$0xff]   ;;  %2491 = vmatpush3.bf16.msra.mxu0 %v2792_v1  ;;  %v2797_v7 = vld [vmem:[%s3494_s2 + $0xf0] sm:$0xff]   ;;  %v2800_v10 = vld [vmem:[%s3494_s2 + $0x28] sm:$0xff]   ;;  %s369_s22 = scalar_lea.vmem %s3492_s0, %s2467_s11  ;;  %s379_s21 = scalar_lea.vmem %s3502_s10, %s2467_s11 }
   0xe   : > { %v2794_v4 = vld [vmem:[%s3494_s2 + $0xb8] sm:$0xff]   ;;  %2512 = vmatprep.subr.bf16.mxu1 %v2793_v2  ;;  %2492 = vmatprep.subr.bf16.mxu0 %v2795_v5  ;;  %v2798_v8 = vld [vmem:[%s3494_s2 + $0xb0] sm:$0xff]   ;;  %v2801_v11 = vld [vmem:[%s3494_s2 + $0xe8] sm:$0xff]  }
   0xf   : > { %2513 = vmatpush3.bf16.msra.mxu1 %v2794_v4  ;;  %v2802_v12 = vld [vmem:[%s3494_s2 + $0xa8] sm:$0xff]   ;;  %v2803_v13 = vld [vmem:[%s3494_s2 + $0x60] sm:$0xff]   ;;  %v2807_v17 = vld [vmem:[%s3494_s2 + $0x58] sm:$0xff]  }
  0x10   : > { %2514 = vmatprep.subr.bf16.mxu1 %v2797_v7  ;;  %v2804_v14 = vld [vmem:[%s3494_s2 + $0x20] sm:$0xff]   ;;  %v2808_v18 = vld [vmem:[%s3494_s2 + $0x18] sm:$0xff]   ;;  %v2811_v21 = vld [vmem:[%s3494_s2 + $0x50] sm:$0xff]  }
  0x11   : > { %2493 = vmatpush3.bf16.msra.mxu0 %v2796_v6  ;;  %v2805_v15 = vld [vmem:[%s3494_s2 + $0xe0] sm:$0xff]   ;;  %v2809_v19 = vld [vmem:[%s3494_s2 + $0xd8] sm:$0xff]   ;;  %v2812_v22 = vld [vmem:[%s3494_s2 + $0x10] sm:$0xff]  }
  0x12   : > { %2494 = vmatprep.subr.bf16.mxu0 %v2799_v9  ;;  %v2806_v16 = vld [vmem:[%s3494_s2 + $0xa0] sm:$0xff]   ;;  %v2810_v20 = vld [vmem:[%s3494_s2 + $0x98] sm:$0xff]   ;;  %v2813_v23 = vld [vmem:[%s3494_s2 + $0xd0] sm:$0xff]  }
  0x13   : > { %2515 = vmatpush3.bf16.msra.mxu1 %v2798_v8  ;;  %v2814_v24 = vld [vmem:[%s3494_s2 + $0x90] sm:$0xff]   ;;  %v2815_v25 = vld [vmem:[%s3494_s2 + $0x48] sm:$0xff]   ;;  %v2819_v29 = vld [vmem:[%s3494_s2 + $0x40] sm:$0xff]  }
  0x14   : > { %2516 = vmatprep.subr.bf16.mxu1 %v2801_v11  ;;  %v2816_v26 = vld [vmem:[%s3494_s2 + $0x8] sm:$0xff]   ;;  %v2820_v30 = vld [vmem:[%s3494_s2] sm:$0xff]   ;;  %v2828_v53 = vld [vmem:[%s3494_s2 + $0x138] sm:$0xff]  }
  0x15   : > { %2495 = vmatpush3.bf16.msra.mxu0 %v2800_v10  ;;  %v2817_v27 = vld [vmem:[%s3494_s2 + $0xc8] sm:$0xff]   ;;  %v2821_v31 = vld [vmem:[%s3494_s2 + $0xc0] sm:$0xff]   ;;  %v2838_v56 = vld [vmem:[%s3496_s4 + $0x38] sm:$0xff]  }
  0x16   : > { %2496 = vmatprep.subr.bf16.mxu0 %v2803_v13  ;;  %v2818_v28 = vld [vmem:[%s3494_s2 + $0x88] sm:$0xff]   ;;  %v383_v32 = vld [vmem:[%s369_s22] sm:$0xff]  ;;  %v2830_v59 = vld [vmem:[%s3494_s2 + $0x130] sm:$0xff]  }
  0x17   : > { %2517 = vmatpush3.bf16.msra.mxu1 %v2802_v12  ;;  %v384_v33 = vld [vmem:[%s369_s22 + $0x8] sm:$0xff]  ;;  %389 = vst [vmem:[#allocation2 + $0x8] sm:$0xff] %v383_v32  ;;  %v2824_v34 = vld [vmem:[%s3494_s2 + $0x80] sm:$0xff]   ;;  %v2474_v35 = vpack.c.bf16 %v383_v32, %v383_v32  ;;  %v2839_v60 = vld [vmem:[%s3496_s4 + $0x30] sm:$0xff]   ;;  %s2468_s22 = sshll.u32 %s3504_s14, 3 }
  0x18   : > { %2518 = vmatprep.subr.bf16.mxu1 %v2805_v15  ;;  %390 = vst [vmem:[#allocation2 + $0x10] sm:$0xff] %v384_v33  ;;  %v2475_v36 = vpack.c.bf16 %v384_v33, %v384_v33  ;;  %v2831_v61 = vld [vmem:[%s3494_s2 + $0x128] sm:$0xff]   ;;  %s3146_s27 = scalar_lea.vmem %s3493_s1, %s2468_s22  ;;  %v2832_v63 = vld [vmem:[%s3494_s2 + $0x120] sm:$0xff]   ;;  %v2833_v1 = vld [vmem:[%s3494_s2 + $0x118] sm:$0xff]  }
  0x19   : > { %2497 = vmatpush3.bf16.msra.mxu0 %v2804_v14  ;;  %425 = vst [vmem:[#allocation3 + $0x8] sm:$0xf] %v2474_v35  ;;  %v2841_v62 = vld [vmem:[%s3496_s4 + $0x28] sm:$0xff]   ;;  %v2843_v0 = vld [vmem:[%s3496_s4 + $0x20] sm:$0xff]   ;;  %v2845_v2 = vld [vmem:[%s3496_s4 + $0x18] sm:$0xff]  }
  0x1a   : > { %2498 = vmatprep.subr.bf16.mxu0 %v2807_v17  ;;  %426 = vst [vmem:[#allocation3 + $0x1c] sm:$0xf] %v2475_v36  ;;  %v2834_v4 = vld [vmem:[%s3494_s2 + $0x110] sm:$0xff]   ;;  %v2835_v6 = vld [vmem:[%s3494_s2 + $0x108] sm:$0xff]   ;;  %v2836_v8 = vld [vmem:[%s3494_s2 + $0x100] sm:$0xff]  }
  0x1b   : > { %2519 = vmatpush3.bf16.msra.mxu1 %v2806_v16  ;;  %v2847_v5 = vld [vmem:[%s3496_s4 + $0x10] sm:$0xff]   ;;  %v2849_v7 = vld [vmem:[%s3496_s4 + $0x8] sm:$0xff]   ;;  %v2851_v9 = vld [vmem:[%s3496_s4] sm:$0xff]  }
  0x1c   : > { %2520 = vmatprep.subr.bf16.mxu1 %v2809_v19  ;;  %v2840_v11 = vld [vmem:[%s3498_s6 + $0x38] sm:$0xff]   ;;  %v3192_v12 = vld [vmem:[%s3146_s27] sm:$0xff]   ;;  %v2842_v13 = vld [vmem:[%s3498_s6 + $0x30] sm:$0xff]  }
  0x1d   : > { %2499 = vmatpush3.bf16.msra.mxu0 %v2808_v18  ;;  %v2844_v14 = vld [vmem:[%s3498_s6 + $0x28] sm:$0xff]   ;;  %v2846_v15 = vld [vmem:[%s3498_s6 + $0x20] sm:$0xff]   ;;  %v2848_v16 = vld [vmem:[%s3498_s6 + $0x18] sm:$0xff]  }
  0x1e   : > { %2500 = vmatprep.subr.bf16.mxu0 %v2811_v21  ;;  %v391_v37 = vld [vmem:[#allocation2 + $0x6] sm:$0xff]  ;;  %v2850_v17 = vld [vmem:[%s3498_s6 + $0x10] sm:$0xff]   ;;  %v2856_v21 = vld [vmem:[%s3494_s2 + $0x178] sm:$0xff]  }
  0x1f   : > { %2521 = vmatpush3.bf16.msra.mxu1 %v2810_v20  ;;  %v392_v38 = vld [vmem:[#allocation2 + $0xe] sm:$0xff]  ;;  %v2470_v40 = vpack.c.bf16 %v391_v37, %v391_v37  ;;  %v2854_v19 = vld [vmem:[%s3498_s6] sm:$0xff]   ;;  %v2855_v20 = vld [vmem:[%s3494_s2 + $0x1b8] sm:$0xff]  }
  0x20   : > { %2522 = vmatprep.subr.bf16.mxu1 %v2813_v23  ;;  %v403_v39 = vld [vmem:[#allocation2 + $0x7] sm:$0xff]  ;;  %v2471_v41 = vpack.c.bf16 %v392_v38, %v392_v38  ;;  %v404_v42 = vld [vmem:[#allocation2 + $0xf] sm:$0xff]  ;;  %v2858_v23 = vld [vmem:[%s3494_s2 + $0x1f8] sm:$0xff]  }
  0x21   : > { %2501 = vmatpush3.bf16.msra.mxu0 %v2812_v22  ;;  %v2472_v43 = vpack.c.bf16 %v403_v39, %v403_v39  ;;  %v427_v44 = vld [vmem:[#allocation2 + $0x9] sm:$0xff]  ;;  %v428_v45 = vld [vmem:[#allocation2 + $0x11] sm:$0xff]  ;;  %v2473_v46 = vpack.c.bf16 %v404_v42, %v404_v42  ;;  %401 = vst [vmem:[#allocation3] sm:$0xf] %v2470_v40  ;;  %v2867_v32 = vld [vmem:[%s3494_s2 + $0x1a0] sm:$0xff]  }
  0x22   : > { %2502 = vmatprep.subr.bf16.mxu0 %v2815_v25  ;;  %v2476_v47 = vpack.c.bf16 %v427_v44, %v427_v44  ;;  %v2477_v48 = vpack.c.bf16 %v428_v45, %v428_v45  ;;  %402 = vst [vmem:[#allocation3 + $0x14] sm:$0xf] %v2471_v41  ;;  %v439_v49 = vld [vmem:[#allocation2 + $0xa] sm:$0xff]  ;;  %v440_v50 = vld [vmem:[#allocation2 + $0x12] sm:$0xff]  ;;  %v2868_v33 = vld [vmem:[%s3494_s2 + $0x160] sm:$0xff]  }
  0x23   : > { %2523 = vmatpush3.bf16.msra.mxu1 %v2814_v24  ;;  %413 = vst [vmem:[#allocation3 + $0x4] sm:$0xf] %v2472_v43  ;;  %414 = vst [vmem:[#allocation3 + $0x18] sm:$0xf] %v2473_v46  ;;  %v2478_v51 = vpack.c.bf16 %v439_v49, %v439_v49  ;;  %v2479_v52 = vpack.c.bf16 %v440_v50, %v440_v50  ;;  %v2829_v58 = vld [vmem:[#allocation3 + $0x8] ss:$20 sps:$4 sm:$0xff]  }
  0x24   : > { %2524 = vmatprep.subr.bf16.mxu1 %v2817_v27  ;;  %437 = vst [vmem:[#allocation3 + $0xc] sm:$0xf] %v2476_v47  ;;  %438 = vst [vmem:[#allocation3 + $0x20] sm:$0xf] %v2477_v48  ;;  %v2852_v18 = vld [vmem:[%s3498_s6 + $0x8] sm:$0xff]   ;;  %v2857_v22 = vld [vmem:[%s3494_s2 + $0x238] sm:$0xff]  }
  0x25   : > { %2503 = vmatpush3.bf16.msra.mxu0 %v2816_v26  ;;  %449 = vst [vmem:[#allocation3 + $0x10] sm:$0xf] %v2478_v51  ;;  %450 = vst [vmem:[#allocation3 + $0x24] sm:$0xf] %v2479_v52  ;;  %v2859_v24 = vld [vmem:[%s3494_s2 + $0x1b0] sm:$0xff]   ;;  %v2870_v35 = vld [vmem:[%s3494_s2 + $0x1e0] sm:$0xff]  }
  0x26   : > { %2504 = vmatprep.subr.bf16.mxu0 %v2819_v29  ;;  %v2860_v25 = vld [vmem:[%s3494_s2 + $0x170] sm:$0xff]   ;;  %v2864_v29 = vld [vmem:[%s3494_s2 + $0x168] sm:$0xff]   ;;  %v2871_v36 = vld [vmem:[%s3494_s2 + $0x198] sm:$0xff]  }
  0x27   : > { %2525 = vmatpush3.bf16.msra.mxu1 %v2818_v28  ;;  %v2861_v26 = vld [vmem:[%s3494_s2 + $0x230] sm:$0xff]   ;;  %v2863_v28 = vld [vmem:[%s3494_s2 + $0x1a8] sm:$0xff]   ;;  %v2872_v37 = vld [vmem:[%s3494_s2 + $0x158] sm:$0xff]  }
  0x28   : > { %2526 = vmatprep.subr.bf16.mxu1 %v2821_v31  ;;  %v2862_v27 = vld [vmem:[%s3494_s2 + $0x1f0] sm:$0xff]   ;;  %v2866_v31 = vld [vmem:[%s3494_s2 + $0x1e8] sm:$0xff]   ;;  %v2873_v38 = vld [vmem:[%s3494_s2 + $0x218] sm:$0xff]  }
  0x29   : > { %2505 = vmatpush3.bf16.msra.mxu0 %v2820_v30  ;;  %v2825_v55 = vld [vmem:[#allocation3] ss:$20 sps:$4 sm:$0xff]   ;;  %v2865_v30 = vld [vmem:[%s3494_s2 + $0x228] sm:$0xff]   ;;  %v2874_v39 = vld [vmem:[%s3494_s2 + $0x1d8] sm:$0xff]  }
  0x2a   : > { %2641 = vmatprep.subr.bf16.mxu0 %v2939_v3  ;;  %v2822_v54 = vld [vmem:[#allocation3 + $0x4] ss:$20 sps:$4 sm:$0xff]   ;;  %v2875_v40 = vld [vmem:[%s3494_s2 + $0x190] sm:$0xff]   ;;  %v2879_v44 = vld [vmem:[%s3494_s2 + $0x188] sm:$0xff]  }
  0x2b   : > { %2527 = vmatpush3.bf16.msra.mxu1 %v2824_v34  ;;  %v2826_v57 = vld [vmem:[#allocation3 + $0xc] ss:$20 sps:$4 sm:$0xff]   ;;  %842 = vmatprep.mubr.bf16.mxu0 %v2822_v54  ;;  %v2877_v41 = vld [vmem:[%s3494_s2 + $0x210] sm:$0xff]  }
  0x2c   : > { %2661 = vmatprep.subr.bf16.mxu1 %v2939_v3  ;;  %843 = vmatmul.mubr.bf16.vlgmr.msra.gmra.mxu0 %v2825_v55  ;;  %v2837_v10 = vld [vmem:[#allocation3 + $0x10] ss:$20 sps:$4 sm:$0xff]   ;;  %v2881_v45 = vld [vmem:[%s3494_s2 + $0x208] sm:$0xff]  }
  0x2d   : > { %883 = vmatprep.mubr.bf16.mxu1 %v2826_v57  ;;  %2642 = vmatpush3.bf16.msra.mxu0 %v2828_v53  ;;  %v2869_v34 = vld [vmem:[%s3494_s2 + $0x220] sm:$0xff]   ;;  %v2876_v42 = vld [vmem:[%s3494_s2 + $0x150] sm:$0xff]   ;;  %v2880_v46 = vld [vmem:[%s3494_s2 + $0x148] sm:$0xff]  }
  0x2e   : > { %884 = vmatmul.mubr.bf16.vlgmr.msra.gmra.mxu1 %v2829_v58  ;;  %2643 = vmatprep.subr.bf16.mxu0 %v2939_v3  ;;  %v2878_v43 = vld [vmem:[%s3494_s2 + $0x1d0] sm:$0xff]   ;;  %v2882_v47 = vld [vmem:[%s3494_s2 + $0x1c8] sm:$0xff]   ;;  %v2883_v48 = vld [vmem:[%s3494_s2 + $0x180] sm:$0xff]  }
  0x2f   : > { %2657 = vmatprep.mubr.msk.bf16.mxu0 %vm2940_vm0, %v2939_v3  ;;  %2662 = vmatpush3.bf16.msra.mxu1 %v2838_v56  ;;  %v2885_v49 = vld [vmem:[%s3494_s2 + $0x200] sm:$0xff]  }
  0x30   : > { %2677 = vmatprep.mubr.msk.bf16.mxu1 %vm2940_vm0, %v2939_v3  ;;  %2663 = vmatprep.subr.bf16.mxu1 %v2939_v3  ;;  %v2884_v50 = vld [vmem:[%s3494_s2 + $0x140] sm:$0xff]  }
  0x31   : > { %2644 = vmatpush3.bf16.msra.mxu0 %v2830_v59  ;;  %v2886_v51 = vld [vmem:[%s3494_s2 + $0x1c0] sm:$0xff]  }
  0x32   : > { %2645 = vmatprep.subr.bf16.mxu0 %v2939_v3 }
  0x33   : > { %2664 = vmatpush3.bf16.msra.mxu1 %v2839_v60  ;;  %v2202_v60 = vld [vmem:[%s3495_s3] ss:$0 sm:$0xff] }
  0x34   : > { %2665 = vmatprep.subr.bf16.mxu1 %v2939_v3 }
  0x35   : > { %2646 = vmatpush3.bf16.msra.mxu0 %v2831_v61 }
  0x36   : > { %2647 = vmatprep.subr.bf16.mxu0 %v2939_v3 }
  0x37   : > { %2666 = vmatpush3.bf16.msra.mxu1 %v2841_v62 }
  0x38   : > { %2667 = vmatprep.subr.bf16.mxu1 %v2939_v3 }
  0x39   : > { %2648 = vmatpush3.bf16.msra.mxu0 %v2832_v63 }
  0x3a   : > { %2649 = vmatprep.subr.bf16.mxu0 %v2939_v3 }
  0x3b   : > { %2668 = vmatpush3.bf16.msra.mxu1 %v2843_v0 }
  0x3c   : > { %2669 = vmatprep.subr.bf16.mxu1 %v2939_v3 }
  0x3d   : > { %2650 = vmatpush3.bf16.msra.mxu0 %v2833_v1 }
  0x3e   : > { %2651 = vmatprep.subr.bf16.mxu0 %v2939_v3 }
  0x3f   : > { %2670 = vmatpush3.bf16.msra.mxu1 %v2845_v2 }
  0x40   : > { %2671 = vmatprep.subr.bf16.mxu1 %v2939_v3 }
  0x41   : > { %2652 = vmatpush3.bf16.msra.mxu0 %v2834_v4 }
  0x42   : > { %2653 = vmatprep.subr.bf16.mxu0 %v2939_v3 }
  0x43   : > { %2672 = vmatpush3.bf16.msra.mxu1 %v2847_v5 }
  0x44   : > { %2673 = vmatprep.subr.bf16.mxu1 %v2939_v3 }
  0x45   : > { %2654 = vmatpush3.bf16.msra.mxu0 %v2835_v6 }
  0x46   : > { %2655 = vmatprep.subr.bf16.mxu0 %v2939_v3 }
  0x47   : > { %2674 = vmatpush3.bf16.msra.mxu1 %v2849_v7 }
  0x48   : > { %2675 = vmatprep.subr.bf16.mxu1 %v2939_v3 }
  0x49   : > { %2656 = vmatpush3.bf16.msra.mxu0 %v2836_v8 }
  0x4a   : > { %2681 = vmatprep.subr.bf16.mxu0 %v2939_v3 }
  0x4b   : > { %2676 = vmatpush3.bf16.msra.mxu1 %v2851_v9 }
  0x4c   : > { %2658 = vmatmul.mubr.bf16.vlgmr.msra.gmra.mxu0 %v2837_v10  ;;  %2561 = vmatprep.subr.bf16.mxu1 %v2855_v20 }
  0x4d   : > { %2682 = vmatpush3.bf16.msra.mxu0 %v2840_v11  ;;  %2697 = vmatprep.mubr.msk.bf16.mxu0 %vm2940_vm0, %v2939_v3 }
  0x4e   : > { %2683 = vmatprep.subr.bf16.mxu0 %v2939_v3  ;;  %2678 = vmatmul.mubr.bf16.vlgmr.msra.gmra.mxu1 %v3192_v12 }
  0x4f   : > { %2562 = vmatpush3.bf16.msra.mxu1 %v2856_v21 }
  0x50   : > { %2563 = vmatprep.subr.bf16.mxu1 %v2859_v24 }
  0x51   : > { %2684 = vmatpush3.bf16.msra.mxu0 %v2842_v13 }
  0x52   : > { %2685 = vmatprep.subr.bf16.mxu0 %v2939_v3 }
  0x53   : > { %2564 = vmatpush3.bf16.msra.mxu1 %v2860_v25 }
  0x54   : > { %2565 = vmatprep.subr.bf16.mxu1 %v2863_v28 }
  0x55   : > { %2686 = vmatpush3.bf16.msra.mxu0 %v2844_v14 }
  0x56   : > { %2687 = vmatprep.subr.bf16.mxu0 %v2939_v3 }
  0x57   : > { %2566 = vmatpush3.bf16.msra.mxu1 %v2864_v29 }
  0x58   : > { %2567 = vmatprep.subr.bf16.mxu1 %v2867_v32 }
  0x59   : > { %2688 = vmatpush3.bf16.msra.mxu0 %v2846_v15 }
  0x5a   : > { %2689 = vmatprep.subr.bf16.mxu0 %v2939_v3 }
  0x5b   : > { %2568 = vmatpush3.bf16.msra.mxu1 %v2868_v33 }
  0x5c   : > { %2569 = vmatprep.subr.bf16.mxu1 %v2871_v36 }
  0x5d   : > { %2690 = vmatpush3.bf16.msra.mxu0 %v2848_v16 }
  0x5e   : > { %2691 = vmatprep.subr.bf16.mxu0 %v2939_v3 }
  0x5f   : > { %2570 = vmatpush3.bf16.msra.mxu1 %v2872_v37 }
  0x60   : > { %2571 = vmatprep.subr.bf16.mxu1 %v2875_v40 }
  0x61   : > { %2692 = vmatpush3.bf16.msra.mxu0 %v2850_v17 }
  0x62   : > { %2693 = vmatprep.subr.bf16.mxu0 %v2939_v3 }
  0x63   : > { %2572 = vmatpush3.bf16.msra.mxu1 %v2876_v42 }
  0x64   : > { %2573 = vmatprep.subr.bf16.mxu1 %v2879_v44 }
  0x65   : > { %2694 = vmatpush3.bf16.msra.mxu0 %v2852_v18 }
  0x66   : > { %2695 = vmatprep.subr.bf16.mxu0 %v2939_v3 }
  0x67   : > { %2574 = vmatpush3.bf16.msra.mxu1 %v2880_v46 }
  0x68   : > { %2575 = vmatprep.subr.bf16.mxu1 %v2883_v48 }
  0x69   : > { %2696 = vmatpush3.bf16.msra.mxu0 %v2854_v19 }
  0x6a   : > { %2583 = vmatprep.subr.bf16.mxu0 %v2857_v22 }
  0x6b   : > { %2576 = vmatpush3.bf16.msra.mxu1 %v2884_v50 }
  0x6c   : > { %2698 = vmatmul.mubr.bf16.vlgmr.msra.gmra.mxu0 %v3192_v12  ;;  %2701 = vmatprep.subr.bf16.mxu1 %v2939_v3 }
  0x6d   : > { %2584 = vmatpush3.bf16.msra.mxu0 %v2858_v23 }
  0x6e   : > { %2585 = vmatprep.subr.bf16.mxu0 %v2861_v26 }
  0x71   : > { %2586 = vmatpush3.bf16.msra.mxu0 %v2862_v27 }
  0x72   : > { %2587 = vmatprep.subr.bf16.mxu0 %v2865_v30 }
  0x75   : > { %2588 = vmatpush3.bf16.msra.mxu0 %v2866_v31 }
  0x76   : > { %2589 = vmatprep.subr.bf16.mxu0 %v2869_v34 }
  0x79   : > { %2590 = vmatpush3.bf16.msra.mxu0 %v2870_v35 }
  0x7a   : > { %2591 = vmatprep.subr.bf16.mxu0 %v2873_v38 }
  0x7d   : > { %2592 = vmatpush3.bf16.msra.mxu0 %v2874_v39 }
  0x7e   : > { %2593 = vmatprep.subr.bf16.mxu0 %v2877_v41 }
  0x81   : > { %2594 = vmatpush3.bf16.msra.mxu0 %v2878_v43  ;;  %v2248_v43 = vld [vmem:[%s3497_s5] ss:$0 sm:$0xff] }
  0x82   : > { %2595 = vmatprep.subr.bf16.mxu0 %v2881_v45 }
  0x85   : > { %2596 = vmatpush3.bf16.msra.mxu0 %v2882_v47  ;;  %v2258_v47 = vld [vmem:[%s3499_s7] ss:$0 sm:$0xff] }
  0x86   : > { %2597 = vmatprep.subr.bf16.mxu0 %v2885_v49 }
  0x89   : > { %2598 = vmatpush3.bf16.msra.mxu0 %v2886_v51 }
  0x8a   : > { %2721 = vmatprep.subr.bf16.mxu0 %v2939_v3 }
  0xec   : > { %v2506_v52 = vpop.f32.mrf.mxu0 }
  0xee   : > { %v2507_v53 = vpop.f32.mrf.mxu0  ;;  %v2528_v54 = vpop.f32.mrf.mxu1 }
  0xef   : > { %v2508_v59 = vadd.f32 %v2507_v53, %v2506_v52 }
  0xf0   : > { %v2509_v55 = vpop.f32.mrf.mxu0  ;;  %v2529_v56 = vpop.f32.mrf.mxu1 }
  0xf1   : > { %v845_v63 = vadd.f32 %v2508_v59, %v2202_v60  ;;  %v2530_v0 = vadd.f32 %v2529_v56, %v2528_v54 }
  0xf2   : > { %v2510_v57 = vpop.f32.mrf.mxu0  ;;  %v2531_v58 = vpop.f32.mrf.mxu1 }
  0xf3   : > { %v2511_v61 = vadd.f32 %v2510_v57, %v2509_v55  ;;  %v886_v3 = vadd.f32 %v2530_v0, %v845_v63 }
  0xf4   : > { %v2532_v62 = vpop.f32.mrf.mxu1 }
  0xf5   : > { %v848_v1 = vadd.f32 %v2511_v61, %v2202_v60  ;;  %v2533_v2 = vadd.f32 %v2532_v62, %v2531_v58 }
  0xf7   : > { %v889_v8 = vadd.f32 %v2533_v2, %v848_v1 }
 0x10c   : > { %v926_v4 = vpop.f32.mrf.mxu0 }
 0x10d   : > { %v927_v7 = vadd.f32 %v926_v4, %v886_v3 }
 0x10e   : > { %v2659_v5 = vpop.f32.mrf.mxu0  ;;  %v1069_v6 = vpop.f32.mrf.mxu1 }
 0x10f   : > { %v933_v15 = vmax.f32 %v927_v7, 0.0  ;;  %v1070_v44 = vadd.f32 %v2248_v43, %v1069_v6 }
 0x110   : > { %v929_v9 = vpop.f32.mrf.mxu0  ;;  %v2679_v10 = vpop.f32.mrf.mxu1 }
 0x111   : > { %v930_v11 = vadd.f32 %v929_v9, %v889_v8  ;;  %v2893_v10 = vld [vmem:[%s3494_s2 + $0x278] sm:$0xff]  }
 0x112   : > { %v2660_v13 = vpop.f32.mrf.mxu0  ;;  %v1072_v14 = vpop.f32.mrf.mxu1 }
 0x113   : > { %v934_v16 = vmax.f32 %v930_v11, 0.0  ;;  %v1073_v45 = vadd.f32 %v2248_v43, %v1072_v14  ;;  %v2902_v14 = vld [vmem:[%s3496_s4 + $0x78] sm:$0xff]   ;;  %v2920_v43 = vld [vmem:[%s3500_s8 + $0x28] sm:$0xff]  }
 0x114   : > { %v2680_v17 = vpop.f32.mrf.mxu1 }
 0x115   : > { %v935_v18 = vadd.f32 %v934_v16, %v933_v15  ;;  %v2894_v17 = vld [vmem:[%s3494_s2 + $0x270] sm:$0xff]  }
 0x117   : > { %v936_v19 = vrot.slane %v935_v18, 4 }
 0x119   : > { %v937_v20 = vadd.f32 %v936_v19, %v935_v18  ;;  %v3343_v18 = vld [vmem:[#allocation2] sm:$0xff]  ;;  %v2903_v19 = vld [vmem:[%s3496_s4 + $0x70] sm:$0xff]  }
 0x11b   : > { %v938_v21 = vrot.slane %v937_v20, 2 }
 0x11d   : > { %v939_v22 = vadd.f32 %v938_v21, %v937_v20  ;;  %v2895_v20 = vld [vmem:[%s3494_s2 + $0x268] sm:$0xff]  }
 0x11e   : > { %v2905_v21 = vld [vmem:[%s3496_s4 + $0x68] sm:$0xff]  }
 0x11f   : > { %v940_v23 = vrot.slane %v939_v22, 1 }
 0x121   : > { %v941_v24 = vadd.f32 %v940_v23, %v939_v22  ;;  %v2896_v22 = vld [vmem:[%s3494_s2 + $0x260] sm:$0xff]  }
 0x122   : > { %v2907_v23 = vld [vmem:[%s3496_s4 + $0x60] sm:$0xff]  }
 0x123   : > { %v943_v25 = vmul.f32 0.0625, %v941_v24  ;;  %v2897_v24 = vld [vmem:[%s3494_s2 + $0x258] sm:$0xff]  }
 0x125   : > { %v944_v26 = vsub.f32 %v933_v15, %v943_v25  ;;  %v945_v27 = vsub.f32 %v934_v16, %v943_v25  ;;  %v2909_v25 = vld [vmem:[%s3496_s4 + $0x58] sm:$0xff]  }
 0x127   : > { %v946_v28 = vmul.f32 %v944_v26, %v944_v26  ;;  %v947_v29 = vmul.f32 %v945_v27, %v945_v27 }
 0x129   : > { %v948_v30 = vadd.f32 %v947_v29, %v946_v28  ;;  %v2899_v28 = vld [vmem:[%s3494_s2 + $0x248] sm:$0xff]  }
 0x12a   : > { %v2913_v29 = vld [vmem:[%s3496_s4 + $0x48] sm:$0xff]  }
 0x12b   : > { %v949_v31 = vrot.slane %v948_v30, 4 }
 0x12c   : > { %v1181_v32 = vpop.f32.mrf.mxu0 }
 0x12d   : > { %v950_v33 = vadd.f32 %v949_v31, %v948_v30  ;;  %v1182_v50 = vadd.f32 %v2258_v47, %v1181_v32  ;;  %v2900_v30 = vld [vmem:[%s3494_s2 + $0x240] sm:$0xff]   ;;  %v2904_v32 = vld [vmem:[%s3498_s6 + $0x78] sm:$0xff]  }
 0x12e   : > { %v2699_v34 = vpop.f32.mrf.mxu0  ;;  %v2915_v31 = vld [vmem:[%s3496_s4 + $0x40] sm:$0xff]  }
 0x12f   : > { %v951_v35 = vrot.slane %v950_v33, 2  ;;  %v2906_v34 = vld [vmem:[%s3498_s6 + $0x70] sm:$0xff]  }
 0x130   : > { %v1184_v36 = vpop.f32.mrf.mxu0 }
 0x131   : > { %v952_v37 = vadd.f32 %v951_v35, %v950_v33  ;;  %v1185_v52 = vadd.f32 %v2258_v47, %v1184_v36  ;;  %v2908_v35 = vld [vmem:[%s3498_s6 + $0x68] sm:$0xff]   ;;  %v2910_v36 = vld [vmem:[%s3498_s6 + $0x60] sm:$0xff]  }
 0x132   : > { %v2700_v38 = vpop.f32.mrf.mxu0  ;;  %v2925_v47 = vld [vmem:[%s3500_s8] sm:$0xff]  }
 0x133   : > { %v953_v39 = vrot.slane %v952_v37, 1  ;;  %v2914_v38 = vld [vmem:[%s3498_s6 + $0x50] sm:$0xff]  }
 0x135   : > { %v954_v40 = vadd.f32 %v953_v39, %v952_v37  ;;  %v2912_v37 = vld [vmem:[%s3498_s6 + $0x58] sm:$0xff]   ;;  %v2916_v39 = vld [vmem:[%s3498_s6 + $0x48] sm:$0xff]  }
 0x137   : > { %v955_v41 = vmul.f32 0.0625, %v954_v40  ;;  %v2917_v40 = vld [vmem:[%s3498_s6 + $0x40] sm:$0xff]  }
 0x139   : > { %v956_v42 = vadd.f32 1e-05, %v955_v41  ;;  %v2918_v41 = vld [vmem:[%s3500_s8 + $0x38] sm:$0xff]  }
 0x13b   : > { %2926 = vrsqrt.f32 %v956_v42  ;;  %v2919_v42 = vld [vmem:[%s3500_s8 + $0x30] sm:$0xff]  }
 0x148   : > { %v2927_v46 = vpop.eup %2926 }
 0x149   : > { %v1188_v48 = vmul.f32 %v2927_v46, %v1070_v44  ;;  %v1189_v49 = vmul.f32 %v2927_v46, %v1073_v45  ;;  %v2922_v44 = vld [vmem:[%s3500_s8 + $0x18] sm:$0xff]   ;;  %v2923_v45 = vld [vmem:[%s3500_s8 + $0x10] sm:$0xff]   ;;  %v2924_v46 = vld [vmem:[%s3500_s8 + $0x8] sm:$0xff]  }
 0x14b   : > { %v1190_v51 = vmul.f32 %v1188_v48, %v944_v26  ;;  %v1191_v53 = vmul.f32 %v1189_v49, %v945_v27  ;;  %v2898_v26 = vld [vmem:[%s3494_s2 + $0x250] sm:$0xff]  }
 0x14c   : > { %v2911_v27 = vld [vmem:[%s3496_s4 + $0x50] sm:$0xff]  }
 0x14d   : > { %v1192_v54 = vadd.f32 %v1190_v51, %v1182_v50  ;;  %v1193_v55 = vadd.f32 %v1191_v53, %v1185_v52 }
 0x14f   : > { %1194 = vst [vmem:[#allocation2 + $0x8] sm:$0xff] %v1192_v54  ;;  %1195 = vst [vmem:[#allocation2 + $0x10] sm:$0xff] %v1193_v55  ;;  %v2484_v56 = vpack.c.bf16 %v1192_v54, %v1192_v54  ;;  %v2485_v57 = vpack.c.bf16 %v1193_v55, %v1193_v55  ;;  %v2358_v55 = vld [vmem:[%s3495_s3 + $0x1] ss:$0 sm:$0xff] }
 0x151   : > { %1230 = vst [vmem:[#allocation3 + $0x8] sm:$0xf] %v2484_v56  ;;  %1231 = vst [vmem:[#allocation3 + $0x1c] sm:$0xf] %v2485_v57 }
 0x156   : > { %v1196_v58 = vld [vmem:[#allocation2 + $0x6] sm:$0xff]  ;;  %v1197_v59 = vld [vmem:[#allocation2 + $0xe] sm:$0xff] }
 0x157   : > { %v1208_v60 = vld [vmem:[#allocation2 + $0x7] sm:$0xff]  ;;  %v2480_v61 = vpack.c.bf16 %v1196_v58, %v1196_v58  ;;  %v2481_v62 = vpack.c.bf16 %v1197_v59, %v1197_v59  ;;  %v1209_v63 = vld [vmem:[#allocation2 + $0xf] sm:$0xff] }
 0x158   : > { %v2482_v0 = vpack.c.bf16 %v1208_v60, %v1208_v60  ;;  %v1232_v1 = vld [vmem:[#allocation2 + $0x9] sm:$0xff]  ;;  %v1233_v2 = vld [vmem:[#allocation2 + $0x11] sm:$0xff]  ;;  %v2483_v4 = vpack.c.bf16 %v1209_v63, %v1209_v63 }
 0x159   : > { %v2486_v3 = vpack.c.bf16 %v1232_v1, %v1232_v1  ;;  %v2487_v5 = vpack.c.bf16 %v1233_v2, %v1233_v2  ;;  %v1244_v6 = vld [vmem:[#allocation2 + $0xa] sm:$0xff]  ;;  %v1245_v7 = vld [vmem:[#allocation2 + $0x12] sm:$0xff]  ;;  %1206 = vst [vmem:[#allocation3] sm:$0xf] %v2480_v61  ;;  %1207 = vst [vmem:[#allocation3 + $0x14] sm:$0xf] %v2481_v62 }
 0x15a   : > { %1218 = vst [vmem:[#allocation3 + $0x4] sm:$0xf] %v2482_v0  ;;  %v2488_v8 = vpack.c.bf16 %v1244_v6, %v1244_v6  ;;  %v2489_v9 = vpack.c.bf16 %v1245_v7, %v1245_v7  ;;  %1219 = vst [vmem:[#allocation3 + $0x18] sm:$0xf] %v2483_v4  ;;  %v2890_v15 = vld [vmem:[#allocation3 + $0x8] ss:$20 sps:$4 sm:$0xff]  }
 0x15b   : > { %1242 = vst [vmem:[#allocation3 + $0xc] sm:$0xf] %v2486_v3  ;;  %1243 = vst [vmem:[#allocation3 + $0x20] sm:$0xf] %v2487_v5 }
 0x15c   : > { %1254 = vst [vmem:[#allocation3 + $0x10] sm:$0xf] %v2488_v8  ;;  %1255 = vst [vmem:[#allocation3 + $0x24] sm:$0xf] %v2489_v9 }
 0x160   : > { %v2887_v11 = vld [vmem:[#allocation3] ss:$20 sps:$4 sm:$0xff]  }
 0x161   : > { %v2889_v13 = vld [vmem:[#allocation3 + $0x4] ss:$20 sps:$4 sm:$0xff]  }
 0x162   : > { %1649 = vmatprep.mubr.bf16.mxu1 %v2889_v13  ;;  %v2892_v16 = vld [vmem:[#allocation3 + $0xc] ss:$20 sps:$4 sm:$0xff]  }
 0x163   : > { %1650 = vmatmul.mubr.bf16.vlgmr.msra.gmra.mxu1 %v2887_v11  ;;  %1690 = vmatprep.mubr.bf16.mxu0 %v2892_v16  ;;  %v2901_v33 = vld [vmem:[#allocation3 + $0x10] ss:$20 sps:$4 sm:$0xff]  }
 0x164   : > { %2702 = vmatpush3.bf16.msra.mxu1 %v2893_v10  ;;  %1691 = vmatmul.mubr.bf16.vlgmr.msra.gmra.mxu0 %v2890_v15 }
 0x165   : > { %2703 = vmatprep.subr.bf16.mxu1 %v3343_v18  ;;  %2717 = vmatprep.mubr.msk.bf16.mxu1 %vm2940_vm0, %v3343_v18 }
 0x166   : > { %2722 = vmatpush3.bf16.msra.mxu0 %v2902_v14  ;;  %2737 = vmatprep.mubr.msk.bf16.mxu0 %vm2940_vm0, %v3343_v18 }
 0x167   : > { %2723 = vmatprep.subr.bf16.mxu0 %v3343_v18 }
 0x168   : > { %2704 = vmatpush3.bf16.msra.mxu1 %v2894_v17 }
 0x169   : > { %2705 = vmatprep.subr.bf16.mxu1 %v3343_v18 }
 0x16a   : > { %2724 = vmatpush3.bf16.msra.mxu0 %v2903_v19 }
 0x16b   : > { %2725 = vmatprep.subr.bf16.mxu0 %v3343_v18 }
 0x16c   : > { %2706 = vmatpush3.bf16.msra.mxu1 %v2895_v20 }
 0x16d   : > { %2707 = vmatprep.subr.bf16.mxu1 %v3343_v18 }
 0x16e   : > { %2726 = vmatpush3.bf16.msra.mxu0 %v2905_v21 }
 0x16f   : > { %2727 = vmatprep.subr.bf16.mxu0 %v3343_v18 }
 0x170   : > { %2708 = vmatpush3.bf16.msra.mxu1 %v2896_v22 }
 0x171   : > { %2709 = vmatprep.subr.bf16.mxu1 %v3343_v18 }
 0x172   : > { %2728 = vmatpush3.bf16.msra.mxu0 %v2907_v23 }
 0x173   : > { %2729 = vmatprep.subr.bf16.mxu0 %v3343_v18 }
 0x174   : > { %2710 = vmatpush3.bf16.msra.mxu1 %v2897_v24 }
 0x175   : > { %2711 = vmatprep.subr.bf16.mxu1 %v3343_v18 }
 0x176   : > { %2730 = vmatpush3.bf16.msra.mxu0 %v2909_v25 }
 0x177   : > { %2731 = vmatprep.subr.bf16.mxu0 %v3343_v18 }
 0x178   : > { %2712 = vmatpush3.bf16.msra.mxu1 %v2898_v26 }
 0x179   : > { %2713 = vmatprep.subr.bf16.mxu1 %v3343_v18 }
 0x17a   : > { %2732 = vmatpush3.bf16.msra.mxu0 %v2911_v27 }
 0x17b   : > { %2733 = vmatprep.subr.bf16.mxu0 %v3343_v18 }
 0x17c   : > { %2714 = vmatpush3.bf16.msra.mxu1 %v2899_v28 }
 0x17d   : > { %2715 = vmatprep.subr.bf16.mxu1 %v3343_v18 }
 0x17e   : > { %2734 = vmatpush3.bf16.msra.mxu0 %v2913_v29 }
 0x17f   : > { %2735 = vmatprep.subr.bf16.mxu0 %v3343_v18 }
 0x180   : > { %2716 = vmatpush3.bf16.msra.mxu1 %v2900_v30 }
 0x181   : > { %2741 = vmatprep.subr.bf16.mxu1 %v3343_v18 }
 0x182   : > { %2736 = vmatpush3.bf16.msra.mxu0 %v2915_v31 }
 0x183   : > { %2718 = vmatmul.mubr.bf16.vlgmr.msra.gmra.mxu1 %v2901_v33  ;;  %2761 = vmatprep.subr.bf16.mxu0 %v3343_v18 }
 0x184   : > { %2742 = vmatpush3.bf16.msra.mxu1 %v2904_v32  ;;  %2757 = vmatprep.mubr.msk.bf16.mxu1 %vm2940_vm0, %v3343_v18 }
 0x185   : > { %2743 = vmatprep.subr.bf16.mxu1 %v3343_v18  ;;  %2738 = vmatmul.mubr.bf16.vlgmr.msra.gmra.mxu0 %v3192_v12 }
 0x186   : > { %2777 = vmatprep.mubr.msk.bf16.mxu0 %vm2940_vm0, %v3343_v18  ;;  %2762 = vmatpush3.bf16.msra.mxu0 %v2918_v41 }
 0x187   : > { %2763 = vmatprep.subr.bf16.mxu0 %v3343_v18 }
 0x188   : > { %2744 = vmatpush3.bf16.msra.mxu1 %v2906_v34 }
 0x189   : > { %2745 = vmatprep.subr.bf16.mxu1 %v3343_v18 }
 0x18a   : > { %2764 = vmatpush3.bf16.msra.mxu0 %v2919_v42 }
 0x18b   : > { %2765 = vmatprep.subr.bf16.mxu0 %v3343_v18 }
 0x18c   : > { %2746 = vmatpush3.bf16.msra.mxu1 %v2908_v35 }
 0x18d   : > { %2747 = vmatprep.subr.bf16.mxu1 %v3343_v18 }
 0x18e   : > { %2766 = vmatpush3.bf16.msra.mxu0 %v2920_v43  ;;  %v2447_v43 = vld [vmem:[%s3499_s7 + $0x1] ss:$0 sm:$0xff] }
 0x18f   : > { %2767 = vmatprep.subr.bf16.mxu0 %v3343_v18 }
 0x190   : > { %2748 = vmatpush3.bf16.msra.mxu1 %v2910_v36 }
 0x191   : > { %2749 = vmatprep.subr.bf16.mxu1 %v3343_v18 }
 0x194   : > { %2750 = vmatpush3.bf16.msra.mxu1 %v2912_v37 }
 0x195   : > { %2751 = vmatprep.subr.bf16.mxu1 %v3343_v18 }
 0x198   : > { %2752 = vmatpush3.bf16.msra.mxu1 %v2914_v38 }
 0x199   : > { %2753 = vmatprep.subr.bf16.mxu1 %v3343_v18 }
 0x19c   : > { %2754 = vmatpush3.bf16.msra.mxu1 %v2916_v39  ;;  %v2421_v39 = vld [vmem:[%s3497_s5 + $0x1] ss:$0 sm:$0xff] }
 0x19d   : > { %2755 = vmatprep.subr.bf16.mxu1 %v3343_v18 }
 0x1a0   : > { %2756 = vmatpush3.bf16.msra.mxu1 %v2917_v40 }
 0x1a3   : > { %2758 = vmatmul.mubr.bf16.vlgmr.msra.gmra.mxu1 %v3192_v12  ;;  %v2921_v12 = vld [vmem:[%s3500_s8 + $0x20] sm:$0xff]  }
 0x1a4   : > { %2768 = vmatpush3.bf16.msra.mxu0 %v2921_v12 }
 0x1a5   : > { %2769 = vmatprep.subr.bf16.mxu0 %v3343_v18 }
 0x1a8   : > { %2770 = vmatpush3.bf16.msra.mxu0 %v2922_v44 }
 0x1a9   : > { %2771 = vmatprep.subr.bf16.mxu0 %v3343_v18 }
 0x1ac   : > { %2772 = vmatpush3.bf16.msra.mxu0 %v2923_v45 }
 0x1ad   : > { %2773 = vmatprep.subr.bf16.mxu0 %v3343_v18 }
 0x1b0   : > { %2774 = vmatpush3.bf16.msra.mxu0 %v2924_v46 }
 0x1b1   : > { %2775 = vmatprep.subr.bf16.mxu0 %v3343_v18 }
 0x1b4   : > { %2776 = vmatpush3.bf16.msra.mxu0 %v2925_v47 }
 0x223   : > { %v2577_v48 = vpop.f32.mrf.mxu1 }
 0x224   : > { %v2599_v50 = vpop.f32.mrf.mxu0 }
 0x225   : > { %v2578_v49 = vpop.f32.mrf.mxu1 }
 0x226   : > { %v2600_v52 = vpop.f32.mrf.mxu0  ;;  %v2579_v54 = vadd.f32 %v2578_v49, %v2577_v48 }
 0x227   : > { %v2580_v51 = vpop.f32.mrf.mxu1  ;;  %v2601_v60 = vadd.f32 %v2600_v52, %v2599_v50  ;;  %v2456_v52 = vld [vmem:[%s3501_s9] ss:$0 sm:$0xff] }
 0x228   : > { %v2602_v56 = vpop.f32.mrf.mxu0  ;;  %v1652_v58 = vadd.f32 %v2579_v54, %v2358_v55 }
 0x229   : > { %v2581_v53 = vpop.f32.mrf.mxu1 }
 0x22a   : > { %v2582_v57 = vadd.f32 %v2581_v53, %v2580_v51  ;;  %v2603_v59 = vpop.f32.mrf.mxu0  ;;  %v1693_v0 = vadd.f32 %v2601_v60, %v1652_v58 }
 0x22b   : > { %v2604_v63 = vadd.f32 %v2603_v59, %v2602_v56 }
 0x22c   : > { %v1655_v61 = vadd.f32 %v2582_v57, %v2358_v55 }
 0x22e   : > { %v1696_v3 = vadd.f32 %v2604_v63, %v1655_v61 }
 0x243   : > { %v1733_v62 = vpop.f32.mrf.mxu1 }
 0x244   : > { %v1734_v4 = vadd.f32 %v1733_v62, %v1693_v0 }
 0x245   : > { %v2719_v1 = vpop.f32.mrf.mxu1  ;;  %v1871_v2 = vpop.f32.mrf.mxu0 }
 0x246   : > { %v1740_v10 = vmax.f32 %v1734_v4, 0.0  ;;  %v1872_v40 = vadd.f32 %v2421_v39, %v1871_v2 }
 0x247   : > { %v1736_v5 = vpop.f32.mrf.mxu1  ;;  %v2739_v6 = vpop.f32.mrf.mxu0 }
 0x248   : > { %v1737_v7 = vadd.f32 %v1736_v5, %v1696_v3 }
 0x249   : > { %v2720_v8 = vpop.f32.mrf.mxu1  ;;  %v1874_v9 = vpop.f32.mrf.mxu0 }
 0x24a   : > { %v1741_v11 = vmax.f32 %v1737_v7, 0.0  ;;  %v1875_v41 = vadd.f32 %v2421_v39, %v1874_v9 }
 0x24b   : > { %v2740_v13 = vpop.f32.mrf.mxu0 }
 0x24c   : > { %v1742_v14 = vadd.f32 %v1741_v11, %v1740_v10 }
 0x24e   : > { %v1743_v15 = vrot.slane %v1742_v14, 4 }
 0x250   : > { %v1744_v16 = vadd.f32 %v1743_v15, %v1742_v14 }
 0x252   : > { %v1745_v17 = vrot.slane %v1744_v16, 2 }
 0x254   : > { %v1746_v18 = vadd.f32 %v1745_v17, %v1744_v16 }
 0x256   : > { %v1747_v19 = vrot.slane %v1746_v18, 1 }
 0x258   : > { %v1748_v20 = vadd.f32 %v1747_v19, %v1746_v18 }
 0x25a   : > { %v1749_v21 = vmul.f32 0.0625, %v1748_v20 }
 0x25c   : > { %v1750_v22 = vsub.f32 %v1740_v10, %v1749_v21  ;;  %v1751_v23 = vsub.f32 %v1741_v11, %v1749_v21 }
 0x25e   : > { %v1752_v24 = vmul.f32 %v1750_v22, %v1750_v22  ;;  %v1753_v25 = vmul.f32 %v1751_v23, %v1751_v23 }
 0x260   : > { %v1754_v26 = vadd.f32 %v1753_v25, %v1752_v24 }
 0x262   : > { %v1755_v27 = vrot.slane %v1754_v26, 4 }
 0x263   : > { %v1985_v28 = vpop.f32.mrf.mxu1 }
 0x264   : > { %v1756_v29 = vadd.f32 %v1755_v27, %v1754_v26  ;;  %v1986_v45 = vadd.f32 %v2447_v43, %v1985_v28 }
 0x265   : > { %v2759_v30 = vpop.f32.mrf.mxu1 }
 0x266   : > { %v1757_v31 = vrot.slane %v1756_v29, 2 }
 0x267   : > { %v1988_v32 = vpop.f32.mrf.mxu1 }
 0x268   : > { %v1758_v33 = vadd.f32 %v1757_v31, %v1756_v29  ;;  %v1989_v47 = vadd.f32 %v2447_v43, %v1988_v32 }
 0x269   : > { %v2760_v34 = vpop.f32.mrf.mxu1 }
 0x26a   : > { %v1759_v35 = vrot.slane %v1758_v33, 1 }
 0x26c   : > { %v1760_v36 = vadd.f32 %v1759_v35, %v1758_v33 }
 0x26e   : > { %v1761_v37 = vmul.f32 0.0625, %v1760_v36 }
 0x270   : > { %v1762_v38 = vadd.f32 1e-05, %v1761_v37 }
 0x272   : > { %2928 = vrsqrt.f32 %v1762_v38 }
 0x27f   : > { %v2929_v42 = vpop.eup %2928 }
 0x280   : > { %v1992_v12 = vmul.f32 %v2929_v42, %v1872_v40  ;;  %v1993_v44 = vmul.f32 %v2929_v42, %v1875_v41 }
 0x282   : > { %v1994_v46 = vmul.f32 %v1992_v12, %v1750_v22  ;;  %v1995_v48 = vmul.f32 %v1993_v44, %v1751_v23 }
 0x284   : > { %v1996_v49 = vadd.f32 %v1994_v46, %v1986_v45  ;;  %v1997_v50 = vadd.f32 %v1995_v48, %v1989_v47 }
 0x286   : > { %v1998_v51 = vpack.c.bf16 %v1997_v50, %v1996_v49 }
 0x288   : > { %2778 = vmatmul.mubr.bf16.vlgmr.msra.gmra.mxu0 %v1998_v51 }
 0x348   : > { %v2104_v53 = vpop.f32.mrf.mxu0 }
 0x349   : > { %v2105_v54 = vadd.f32 %v2456_v52, %v2104_v53 }
 0x34a   : > { %v2779_v55 = vpop.f32.mrf.mxu0 }
 0x34b   : > { %2112 = vst.msk [vmem:[%s379_s21] sm:$0xff] %vm2111_vm1, %v2105_v54 }
 0x34c   : > { %v2107_v56 = vpop.f32.mrf.mxu0 }
 0x34d   : > { %v2108_v57 = vadd.f32 %v2456_v52, %v2107_v56 }
 0x34e   : > { %v2780_v58 = vpop.f32.mrf.mxu0 }
 0x34f   : > { %2113 = vst.msk [vmem:[%s379_s21 + $0x8] sm:$0xff] %vm2111_vm1, %v2108_v57 }
 0x350 PF: > { %s20_s13 = sadd.s32 1, %s2937_s13  }
 0x351   : > { %p17_p4 = scmp.ge.s32.totalorder %s20_s13, 4  }
 0x353   :  { %19 = sbr.rel (!%p17_p4) target bundleno = 1 (0x1), region = 99 }

</bundles_post_ra>
